<compile_context>
chip_gen: v7x
topology: tpu7x:2x2x1
jax: 0.10.0
libtpu: 0.0.40
codegen_flags: <defaults>
</compile_context>

<pallas_src>
import functools

import jax
import jax.numpy as jnp
from jax.experimental import pallas as pl
from jax.experimental.pallas import tpu as pltpu

f32 = jnp.float32
bf16 = jnp.bfloat16

_VMEM_LIMIT = 32 * 1024 * 1024


def _rup(x, m):
    return (x + m - 1) // m * m


def _pad16(k):
    return _rup(k, 16)


@functools.lru_cache(maxsize=None)
def _num_tensorcores():
    """Gen-gating helper: >1 only on multi-TensorCore chips (v4 megacore / v7x)."""
    try:
        dev = jax.devices()[0]
        nc = getattr(dev, "num_cores", None)
        if isinstance(nc, int) and nc > 0:
            return nc
        kind = str(getattr(dev, "device_kind", "")).lower()
        if "v4" in kind or "v7" in kind:
            return 2
    except Exception:
        pass
    return 1


def _pick_bn(N):
    """Output-channel block size: split only when >1 TensorCore benefits;
       single-TC chips keep a full-extent block (capped at 512 lanes)."""
    if _num_tensorcores() > 1:
        for bn in (512, 256, 128):
            if N > bn and N % bn == 0:
                return bn
        return N
    if N > 512 and N % 512 == 0:
        return 512
    return N


def _pick_m(M):
    if M <= 512:
        Mp = _pad16(M)
        return Mp, Mp
    Mp = _rup(M, 256)
    return Mp, 256


# ---------------------------------------------------------------------------
# Pallas kernels
# ---------------------------------------------------------------------------

def _conv_bn_kernel(a_ref, b_ref, g_ref, be_ref, *rest,
                    count, relu_cols, has_res, eps):
    """conv GEMM + training-mode BatchNorm (batch stats over the single M tile,
       computed in-kernel from the f32 accumulator) + optional residual add +
       (column-masked) ReLU; writes the bf16 activation directly.

       relu_cols: -1 -> ReLU on all columns; 0 -> no activation;
                  k > 0 -> ReLU only on global output columns [0, k)."""
    if has_res:
        r_ref, o_ref = rest
    else:
        (o_ref,) = rest
    acc = jnp.dot(a_ref[...], b_ref[...], preferred_element_type=jnp.float32)
    inv = 1.0 / count                       # count = real (unpadded) M
    s = jnp.sum(acc, axis=0, keepdims=True)       # padded rows are exact zeros
    q = jnp.sum(acc * acc, axis=0, keepdims=True)
    mean = s * inv
    var = jnp.maximum(q * inv - mean * mean, 0.0)
    scale = g_ref[...] * jax.lax.rsqrt(var + eps)
    bias = be_ref[...] - mean * scale
    v = acc * scale + bias
    if has_res:
        v = v + r_ref[...].astype(jnp.float32)
    if relu_cols == -1:
        v = jnp.maximum(v, 0.0)
    elif relu_cols > 0:
        bn = o_ref.shape[-1]
        col = (jax.lax.broadcasted_iota(jnp.int32, v.shape, 1)
               + pl.program_id(0) * bn)
        v = jnp.where(col < relu_cols, jnp.maximum(v, 0.0), v)
    o_ref[...] = v.astype(o_ref.dtype)


def _mm_kernel(a_ref, b_ref, o_ref):
    o_ref[...] = jnp.dot(a_ref[...], b_ref[...],
                         preferred_element_type=jnp.float32).astype(o_ref.dtype)


def _mm_bias_kernel(a_ref, b_ref, bias_ref, o_ref, *, act):
    acc = jnp.dot(a_ref[...], b_ref[...], preferred_element_type=jnp.float32)
    acc = acc + bias_ref[...]
    if act == "relu":
        acc = jnp.maximum(acc, 0.0)
    elif act == "sigmoid":
        acc = jax.nn.sigmoid(acc)
    o_ref[...] = acc.astype(o_ref.dtype)


def _mm_stats_kernel(a_ref, b_ref, o_ref, s_ref, q_ref):
    # conv-transpose matmul + per-column sum / sum-of-squares (stats reduced over
    # the 4 (dh,dw) groups in the wrapper); bf16 main output.
    acc = jnp.dot(a_ref[...], b_ref[...], preferred_element_type=jnp.float32)
    o_ref[...] = acc.astype(o_ref.dtype)
    s_ref[...] = jnp.sum(acc, axis=0, keepdims=True)
    q_ref[...] = jnp.sum(acc * acc, axis=0, keepdims=True)


def _affine_kernel(y_ref, s_ref, b_ref, o_ref):
    v = y_ref[...].astype(jnp.float32) * s_ref[...] + b_ref[...]
    o_ref[...] = v.astype(o_ref.dtype)


def _max9_kernel(p_ref, o_ref):
    o_ref[...] = jnp.max(p_ref[...], axis=0)


# ---------------------------------------------------------------------------
# pallas_call builders (cached per static shape/config)
# ---------------------------------------------------------------------------

def _params(semantics):
    return pltpu.CompilerParams(dimension_semantics=semantics,
                                vmem_limit_bytes=_VMEM_LIMIT)


@functools.lru_cache(maxsize=None)
def _conv_bn_call(Mp, K, N, bn, count, relu_cols, has_res, out_dtype):
    gn = N // bn
    kern = functools.partial(_conv_bn_kernel, count=float(count),
                             relu_cols=relu_cols, has_res=has_res, eps=1e-5)
    in_specs = [pl.BlockSpec((Mp, K), lambda j: (0, 0)),
                pl.BlockSpec((K, bn), lambda j: (0, j)),
                pl.BlockSpec((1, bn), lambda j: (0, j)),
                pl.BlockSpec((1, bn), lambda j: (0, j))]
    if has_res:
        in_specs.append(pl.BlockSpec((Mp, bn), lambda j: (0, j)))
    call = pl.pallas_call(
        kern,
        out_shape=jax.ShapeDtypeStruct((Mp, N), out_dtype),
        grid=(gn,),
        in_specs=in_specs,
        out_specs=pl.BlockSpec((Mp, bn), lambda j: (0, j)),
        compiler_params=_params(("parallel",)),
    )
    return jax.jit(call)


@functools.lru_cache(maxsize=None)
def _mm_call(Mp, K, N, bm, bn, mode, act, out_dtype):
    gm, gn = Mp // bm, N // bn
    a_spec = pl.BlockSpec((bm, K), lambda i, j: (i, 0))
    b_spec = pl.BlockSpec((K, bn), lambda i, j: (0, j))
    o_spec = pl.BlockSpec((bm, bn), lambda i, j: (i, j))
    if mode == "bias":
        kern = functools.partial(_mm_bias_kernel, act=act)
        in_specs = [a_spec, b_spec, pl.BlockSpec((1, bn), lambda i, j: (0, j))]
    else:
        kern = _mm_kernel
        in_specs = [a_spec, b_spec]
    call = pl.pallas_call(
        kern,
        out_shape=jax.ShapeDtypeStruct((Mp, N), out_dtype),
        grid=(gm, gn),
        in_specs=in_specs,
        out_specs=o_spec,
        compiler_params=_params(("parallel", "parallel")),
    )
    return jax.jit(call)


@functools.lru_cache(maxsize=None)
def _mm_stats_call(Mp, K, N, bn, out_dtype):
    gn = N // bn
    call = pl.pallas_call(
        _mm_stats_kernel,
        out_shape=(jax.ShapeDtypeStruct((Mp, N), out_dtype),
                   jax.ShapeDtypeStruct((1, N), f32),
                   jax.ShapeDtypeStruct((1, N), f32)),
        grid=(gn,),
        in_specs=[pl.BlockSpec((Mp, K), lambda j: (0, 0)),
                  pl.BlockSpec((K, bn), lambda j: (0, j))],
        out_specs=(pl.BlockSpec((Mp, bn), lambda j: (0, j)),
                   pl.BlockSpec((1, bn), lambda j: (0, j)),
                   pl.BlockSpec((1, bn), lambda j: (0, j))),
        compiler_params=_params(("parallel",)),
    )
    return jax.jit(call)


@functools.lru_cache(maxsize=None)
def _affine_call(Mp, C, bn, out_dtype):
    gn = C // bn
    call = pl.pallas_call(
        _affine_kernel,
        out_shape=jax.ShapeDtypeStruct((Mp, C), out_dtype),
        grid=(gn,),
        in_specs=[pl.BlockSpec((Mp, bn), lambda j: (0, j)),
                  pl.BlockSpec((1, bn), lambda j: (0, j)),
                  pl.BlockSpec((1, bn), lambda j: (0, j))],
        out_specs=pl.BlockSpec((Mp, bn), lambda j: (0, j)),
        compiler_params=_params(("parallel",)),
    )
    return jax.jit(call)


@functools.lru_cache(maxsize=None)
def _max9_call(Mp, C, dtype):
    call = pl.pallas_call(
        _max9_kernel,
        out_shape=jax.ShapeDtypeStruct((Mp, C), dtype),
        grid=(1,),
        in_specs=[pl.BlockSpec((9, Mp, C), lambda i: (0, 0, 0))],
        out_specs=pl.BlockSpec((Mp, C), lambda i: (0, 0)),
        compiler_params=_params(("arbitrary",)),
    )
    return jax.jit(call)


# ---------------------------------------------------------------------------
# Layer helpers (XLA glue around the Pallas kernels)
# ---------------------------------------------------------------------------

def _im2col(x, kh, kw, stride, padding):
    """NHWC bf16 -> patch matrix (M, Kp) bf16, Kp = kh*kw*Cin rounded up to 16.
       Column (K-axis) order is (dh, dw, cin)."""
    # TODO(synk): fold im2col into the matmul kernel (shifted windows on the whole
    # NHWC VMEM tile) so the patch matrix is never materialized in HBM.
    N, H, W, Cin = x.shape
    Ho = (H + 2 * padding - kh) // stride + 1
    Wo = (W + 2 * padding - kw) // stride + 1
    K = kh * kw * Cin
    if kh == 1 and kw == 1 and stride == 1 and padding == 0 and Cin % 16 == 0:
        return x.reshape(N * H * W, Cin), N, Ho, Wo
    xp = jnp.pad(x, ((0, 0), (padding, padding), (padding, padding), (0, 0)))
    cols = [xp[:, i:i + stride * Ho:stride, j:j + stride * Wo:stride, :]
            for i in range(kh) for j in range(kw)]
    Kp = _pad16(K)
    if Kp != K:
        cols.append(jnp.zeros((N, Ho, Wo, Kp - K), x.dtype))
    pmat = jnp.concatenate(cols, axis=-1).reshape(N * Ho * Wo, Kp)
    return pmat, N, Ho, Wo


def conv_bn(x, w2d, kh, kw, stride, padding, gamma, beta,
            residual=None, relu_cols=-1):
    """conv (bias-less / bias cancels under training-mode BN) + BatchNorm (batch
       statistics) + optional residual add + (column-masked) ReLU, all fused into
       a single matmul pallas_call.  NHWC bf16 in -> NHWC bf16 out."""
    pmat, N, Ho, Wo = _im2col(x, kh, kw, stride, padding)
    M = N * Ho * Wo
    assert M <= 512, "fused conv+BN path expects a single M tile (batch too big)"
    Mp = _pad16(M)
    if Mp != M:
        pmat = jnp.pad(pmat, ((0, Mp - M), (0, 0)))
    K, Ntot = w2d.shape
    bn = _pick_bn(Ntot)
    args = [pmat, w2d,
            gamma.reshape(1, Ntot).astype(f32),
            beta.reshape(1, Ntot).astype(f32)]
    has_res = residual is not None
    if has_res:
        r2 = residual.reshape(M, Ntot)
        if Mp != M:
            r2 = jnp.pad(r2, ((0, Mp - M), (0, 0)))
        args.append(r2)
    out = _conv_bn_call(Mp, K, Ntot, bn, M, relu_cols, has_res, bf16)(*args)
    return out[:M].reshape(N, Ho, Wo, Ntot)


def matmul_plain(a, b, bias=None, act="none", out_dtype=bf16):
    M, K = a.shape
    _, N = b.shape
    Mp, bm = _pick_m(M)
    bn = _pick_bn(N)
    if Mp != M:
        a = jnp.pad(a, ((0, Mp - M), (0, 0)))
    if bias is None and act != "none":
        bias = jnp.zeros((N,), f32)
    if bias is not None:
        y = _mm_call(Mp, K, N, bm, bn, "bias", act, out_dtype)(
            a, b, bias.reshape(1, N).astype(f32))
    else:
        y = _mm_call(Mp, K, N, bm, bn, "plain", act, out_dtype)(a, b)
    return y[:M]


def conv_plain(x, w2d, kh, kw, stride, padding, bias=None, act="none",
               out_dtype=bf16):
    pmat, N, Ho, Wo = _im2col(x, kh, kw, stride, padding)
    Cout = w2d.shape[1]
    y = matmul_plain(pmat, w2d, bias=bias, act=act, out_dtype=out_dtype)
    return y.reshape(N, Ho, Wo, Cout)


def _interleave2x2(y, N, H, W, Cout):
    # TODO(synk): write the 2x2 upsample interleave from the matmul output
    # BlockSpec instead of this (small) reshape/transpose.
    y = y.reshape(N, H, W, 2, 2, Cout).transpose(0, 1, 3, 2, 4, 5)
    return y.reshape(N, 2 * H, 2 * W, Cout)


def conv_transpose2x2(x, w2d, bias=None, act="none", out_dtype=bf16):
    """ConvTranspose2d(kernel=2, stride=2).  w2d: (Cin, 4*Cout), column order
       ((dh*2+dw)*Cout + c).  Optional bias / sigmoid fused in the matmul."""
    N, H, W, Cin = x.shape
    Cout = w2d.shape[1] // 4
    b4 = None if bias is None else jnp.tile(bias, 4)
    y = matmul_plain(x.reshape(N * H * W, Cin), w2d, bias=b4, act=act,
                     out_dtype=out_dtype)
    return _interleave2x2(y, N, H, W, Cout)


def conv_transpose2x2_bn(x, w2d, gamma, beta, eps=1e-5):
    """ConvTranspose2d(2,2) + training-mode BN.  BN cannot be fused per-column
       (stats reduce over the 4 (dh,dw) column groups), so: stats matmul (bf16
       intermediate) -> tiny jnp scale/bias -> affine kernel."""
    N, H, W, Cin = x.shape
    Cout = w2d.shape[1] // 4
    M = N * H * W
    assert M <= 512, "convT+BN stats path expects a single M tile"
    Mp = _pad16(M)
    a = x.reshape(M, Cin)
    if Mp != M:
        a = jnp.pad(a, ((0, Mp - M), (0, 0)))
    Ntot = 4 * Cout
    bn = _pick_bn(Ntot)
    y, s4, q4 = _mm_stats_call(Mp, Cin, Ntot, bn, bf16)(a, w2d)
    s = s4.reshape(4, Cout).sum(axis=0)
    q = q4.reshape(4, Cout).sum(axis=0)
    cnt = 4.0 * M
    mean = s / cnt
    var = jnp.maximum(q / cnt - mean * mean, 0.0)
    scale = gamma * jax.lax.rsqrt(var + eps)
    bias = beta - mean * scale
    out = _affine_call(Mp, Ntot, bn, bf16)(
        y, jnp.tile(scale, 4).reshape(1, Ntot),
        jnp.tile(bias, 4).reshape(1, Ntot))
    return _interleave2x2(out[:M], N, H, W, Cout)


def maxpool3x3s2(x):
    """MaxPool2d(kernel=3, stride=2, padding=1), NHWC bf16."""
    # TODO(synk): compute the 9-way max from the padded tile inside one kernel
    # (in-VMEM shifted slices); the stacked windows are ~0.3 MiB so the absolute
    # HBM cost is negligible.
    N, H, W, C = x.shape
    xp = jnp.pad(x, ((0, 0), (1, 1), (1, 1), (0, 0)), constant_values=-jnp.inf)
    Ho = (H - 1) // 2 + 1
    Wo = (W - 1) // 2 + 1
    cols = [xp[:, kh:kh + 2 * Ho:2, kw:kw + 2 * Wo:2, :]
            for kh in range(3) for kw in range(3)]
    M = N * Ho * Wo
    Mp = _pad16(M)
    p = jnp.stack(cols, axis=0).reshape(9, M, C)
    if Mp != M:
        p = jnp.pad(p, ((0, 0), (0, Mp - M), (0, 0)))
    out = _max9_call(Mp, C, x.dtype)(p)
    return out[:M].reshape(N, Ho, Wo, C)


# ---------------------------------------------------------------------------
# Deterministic parameter construction (synthetic init, torch-equivalent arch)
# ---------------------------------------------------------------------------

ENC_CFG = (((64, 64, 1),) * 3 + ((64, 128, 2),) + ((128, 128, 1),) * 3 +
           ((128, 256, 2),) + ((256, 256, 1),) * 5 + ((256, 512, 2),) +
           ((512, 512, 1),) * 2)
DEC_CFG = (((256, 256, 1),) * 2 + ((256, 256, 2),) + ((256, 256, 1),) * 2 +
           ((256, 128, 2),) + ((128, 128, 1),) * 3 + ((128, 64, 2),) +
           ((64, 64, 1),) * 3)


class ParamGen:
    def __init__(self, seed=0):
        self._key = jax.random.PRNGKey(seed)
        self._i = 0

    def normal(self, shape, scale, dtype=f32):
        self._i += 1
        k = jax.random.fold_in(self._key, self._i)
        return (jax.random.normal(k, shape, f32) * scale).astype(dtype)


def conv_w(pg, kh, kw, cin, cout):
    """GEMM layout ((dh,dw,cin) rows padded to mult of 16, cout), stored bf16."""
    k = kh * kw * cin
    w = pg.normal((k, cout), k ** -0.5, f32)
    kp = _pad16(k)
    if kp != k:
        w = jnp.pad(w, ((0, kp - k), (0, 0)))
    return w.astype(bf16)


def convT_w(pg, cin, cout):
    """GEMM layout (cin, 4*cout), columns ordered ((dh*2+dw)*cout + c), bf16."""
    return pg.normal((cin, 4 * cout), (4 * cin) ** -0.5, bf16)


def make_resblock(pg, cin, cout, stride):
    w1 = conv_w(pg, 3, 3, cin, cout)
    p = {"w2": conv_w(pg, 3, 3, cout, cout),
         "g2": jnp.ones((cout,), f32), "b2": jnp.zeros((cout,), f32)}
    g1 = jnp.ones((cout,), f32)
    b1 = jnp.zeros((cout,), f32)
    if stride != 1 or cin != cout:
        # 1x1 shortcut folded into conv1's GEMM: embed its weight at the
        # centre-tap rows (dh=dw=1 -> rows [4*cin, 5*cin)) and concat along N.
        ws = conv_w(pg, 1, 1, cin, cout)                     # (cin, cout)
        ws_full = jnp.zeros((9 * cin, cout), bf16).at[4 * cin:5 * cin].set(ws)
        gs = jnp.ones((cout,), f32)
        bs = jnp.zeros((cout,), f32)
        p["w1s"] = jnp.concatenate([w1, ws_full], axis=1)    # (9*cin, 2*cout)
        p["g1s"] = jnp.concatenate([g1, gs])
        p["b1s"] = jnp.concatenate([b1, bs])
    else:
        p["w1"] = w1
        p["g1"] = g1
        p["b1"] = b1
    return p


def make_tresblock(pg, cin, cout, stride):
    p = {"w1": conv_w(pg, 3, 3, cin, cin),
         "g1": jnp.ones((cin,), f32), "b1": jnp.zeros((cin,), f32),
         "w2": conv_w(pg, 3, 3, cin, cin),
         "g2": jnp.ones((cin,), f32), "b2": jnp.zeros((cin,), f32)}
    if stride != 1:
        p["wct"] = convT_w(pg, cin, cout)            # ConvTranspose2d(bias=False)
    else:
        p["wc"] = conv_w(pg, 1, 1, cin, cout)        # nn.Conv2d 1x1 (bias=True)
        p["bc"] = pg.normal((cout,), 0.01)
    return p


def make_params(seed=0):
    pg = ParamGen(seed)
    # NOTE: stem conv and decoder ConvT(64,64) have bias=True in torch, but a
    # per-channel bias directly followed by training-mode BatchNorm cancels
    # exactly, so those biases are not generated / applied.
    return {
        "stem_w": conv_w(pg, 7, 7, 3, 64),
        "stem_g": jnp.ones((64,), f32),
        "stem_beta": jnp.zeros((64,), f32),
        "enc": [make_resblock(pg, ci, co, s) for ci, co, s in ENC_CFG],
        "dec": [make_tresblock(pg, ci, co, s) for ci, co, s in DEC_CFG],
        "dT1_w": convT_w(pg, 64, 64),
        "dT1_g": jnp.ones((64,), f32),
        "dT1_beta": jnp.zeros((64,), f32),
        "dT2_w": convT_w(pg, 64, 3),
        "dT2_b": pg.normal((3,), 0.01),
    }


# ---------------------------------------------------------------------------
# Blocks & full forward pass
# ---------------------------------------------------------------------------

def resblock_fwd(x, p, stride, cout):
    if "w1s" in p:
        # one GEMM for conv1 + 1x1 shortcut; ReLU masked to the conv1 columns.
        y2 = conv_bn(x, p["w1s"], 3, 3, stride, 1, p["g1s"], p["b1s"],
                     relu_cols=cout)
        y, sc = y2[..., :cout], y2[..., cout:]
    else:
        y = conv_bn(x, p["w1"], 3, 3, 1, 1, p["g1"], p["b1"], relu_cols=-1)
        sc = x
    # relu(residual_function(x) + shortcut(x)); add + relu fused into the kernel.
    return conv_bn(y, p["w2"], 3, 3, 1, 1, p["g2"], p["b2"],
                   residual=sc, relu_cols=-1)


def tresblock_fwd(x, p):
    identity = x
    y = conv_bn(x, p["w1"], 3, 3, 1, 1, p["g1"], p["b1"], relu_cols=-1)
    # (residual_function(x) + identity) fused into conv2's BN epilogue, no act.
    y = conv_bn(y, p["w2"], 3, 3, 1, 1, p["g2"], p["b2"],
                residual=identity, relu_cols=0)
    if "wct" in p:
        return conv_transpose2x2(y, p["wct"])
    return conv_plain(y, p["wc"], 1, 1, 1, 0, bias=p["bc"])


def resnet34_bernoulli_forward(x_nchw, params, eps_key):
    J = 256
    x = jnp.transpose(x_nchw, (0, 2, 3, 1)).astype(bf16)   # NCHW -> NHWC bf16

    # ---- encoder ----
    y = conv_bn(x, params["stem_w"], 7, 7, 2, 3,
                params["stem_g"], params["stem_beta"], relu_cols=-1)
    y = maxpool3x3s2(y)
    for p, (_, co, s) in zip(params["enc"], ENC_CFG):
        y = resblock_fwd(y, p, s, co)
    code = y                                                # (N, 1, 1, 512) bf16

    mean = code[..., :J].astype(f32)
    std = code[..., J:].astype(f32)
    # NOTE: like the torch reference, std has no positivity constraint.

    # reparameterization: z = mean + std * eps  (tiny -> plain jnp)
    eps = jax.random.normal(eps_key, mean.shape, f32)
    z = (mean + std * eps).astype(bf16)

    # ---- decoder ----
    d = z
    for p in params["dec"]:
        d = tresblock_fwd(d, p)
    d = conv_transpose2x2_bn(d, params["dT1_w"], params["dT1_g"],
                             params["dT1_beta"])
    # final ConvT(64,3): bias + sigmoid fused in the matmul epilogue.
    p_out = conv_transpose2x2(d, params["dT2_w"], bias=params["dT2_b"],
                              act="sigmoid", out_dtype=f32)

    # back to NCHW for PyTorch parity
    return (jnp.transpose(p_out, (0, 3, 1, 2)),
            jnp.transpose(mean, (0, 3, 1, 2)),
            jnp.transpose(std, (0, 3, 1, 2)))


# ---------------------------------------------------------------------------

if __name__ == "__main__":
    key = jax.random.PRNGKey(0)
    kx, keps = jax.random.split(key)
    x = jax.random.normal(kx, (2, 3, 32, 32), f32)          # NCHW, like PyTorch
    params = make_params(seed=0)

    fwd = jax.jit(resnet34_bernoulli_forward)
    p, mean, std = fwd(x, params, keps)
    jax.block_until_ready((p, mean, std))

    assert p.shape == (2, 3, 32, 32)
    assert mean.shape == (2, 256, 1, 1)
    assert std.shape == (2, 256, 1, 1)
    assert bool(jnp.all(jnp.isfinite(p)))
    print("KERNEL_OK")
</pallas_src>

<mosaic_0001>
module attributes {stable_mosaic.version = 11 : i64} {
  func.func @_conv_bn_kernel(%arg0: i32, %arg1: memref<512x160xbf16, #tpu.memory_space<vmem>>, %arg2: memref<160x64xbf16, #tpu.memory_space<vmem>>, %arg3: memref<1x64xf32, #tpu.memory_space<vmem>>, %arg4: memref<1x64xf32, #tpu.memory_space<vmem>>, %arg5: memref<512x64xbf16, #tpu.memory_space<vmem>>) attributes {dimension_semantics = [#tpu.dimension_semantics<parallel>], iteration_bounds = array<i64: 1>, scalar_prefetch = 0 : i64, scratch_operands = 0 : i64, tpu.core_type = #tpu.core_type<tc>, window_params = [{pipeline_mode = #tpu.pipeline_mode<synchronous>, transform_indices = @transform_0, window_bounds = array<i64: 512, 160>}, {transform_indices = @transform_1, window_bounds = array<i64: 160, 64>}, {transform_indices = @transform_2, window_bounds = array<i64: 1, 64>}, {transform_indices = @transform_3, window_bounds = array<i64: 1, 64>}, {transform_indices = @transform_4, window_bounds = array<i64: 512, 64>}]} {
    %c0 = arith.constant 0 : index
    %c0_0 = arith.constant 0 : index
    %0 = vector.load %arg1[%c0, %c0_0] : memref<512x160xbf16, #tpu.memory_space<vmem>>, vector<512x160xbf16>
    %c0_1 = arith.constant 0 : index
    %c0_2 = arith.constant 0 : index
    %1 = vector.load %arg2[%c0_1, %c0_2] : memref<160x64xbf16, #tpu.memory_space<vmem>>, vector<160x64xbf16>
    %cst = arith.constant dense<0.000000e+00> : vector<512x64xf32>
    %2 = tpu.matmul %0, %1, %cst {dimension_numbers = #tpu.dot_dimension_numbers<[1], [0], [0], [1], [0, 0, 1, 1], [], []>} : vector<512x160xbf16>, vector<160x64xbf16>, vector<512x64xf32> -> vector<512x64xf32>
    %cst_3 = arith.constant dense<0.000000e+00> : vector<64xf32>
    %3 = vector.multi_reduction <add>, %2, %cst_3 [0] : vector<512x64xf32> to vector<64xf32>
    %4 = vector.shape_cast %3 : vector<64xf32> to vector<1x64xf32>
    %5 = arith.mulf %2, %2 : vector<512x64xf32>
    %cst_4 = arith.constant dense<0.000000e+00> : vector<64xf32>
    %6 = vector.multi_reduction <add>, %5, %cst_4 [0] : vector<512x64xf32> to vector<64xf32>
    %7 = vector.shape_cast %6 : vector<64xf32> to vector<1x64xf32>
    %cst_5 = arith.constant 0.001953125 : f32
    %8 = vector.broadcast %cst_5 : f32 to vector<1x64xf32>
    %9 = arith.mulf %4, %8 : vector<1x64xf32>
    %cst_6 = arith.constant 0.001953125 : f32
    %10 = vector.broadcast %cst_6 : f32 to vector<1x64xf32>
    %11 = arith.mulf %7, %10 : vector<1x64xf32>
    %12 = arith.mulf %9, %9 : vector<1x64xf32>
    %13 = arith.subf %11, %12 : vector<1x64xf32>
    %cst_7 = arith.constant 0.000000e+00 : f32
    %14 = vector.broadcast %cst_7 : f32 to vector<1x64xf32>
    %15 = arith.maximumf %13, %14 : vector<1x64xf32>
    %c0_8 = arith.constant 0 : index
    %c0_9 = arith.constant 0 : index
    %16 = vector.load %arg3[%c0_8, %c0_9] : memref<1x64xf32, #tpu.memory_space<vmem>>, vector<1x64xf32>
    %cst_10 = arith.constant 9.99999974E-6 : f32
    %17 = vector.broadcast %cst_10 : f32 to vector<1x64xf32>
    %18 = arith.addf %15, %17 : vector<1x64xf32>
    %19 = math.rsqrt %18 : vector<1x64xf32>
    %20 = arith.mulf %16, %19 : vector<1x64xf32>
    %c0_11 = arith.constant 0 : index
    %c0_12 = arith.constant 0 : index
    %21 = vector.load %arg4[%c0_11, %c0_12] : memref<1x64xf32, #tpu.memory_space<vmem>>, vector<1x64xf32>
    %22 = arith.mulf %9, %20 : vector<1x64xf32>
    %23 = arith.subf %21, %22 : vector<1x64xf32>
    %24 = vector.broadcast %20 : vector<1x64xf32> to vector<512x64xf32>
    %25 = arith.mulf %2, %24 : vector<512x64xf32>
    %26 = vector.broadcast %23 : vector<1x64xf32> to vector<512x64xf32>
    %27 = arith.addf %25, %26 : vector<512x64xf32>
    %cst_13 = arith.constant 0.000000e+00 : f32
    %28 = vector.broadcast %cst_13 : f32 to vector<512x64xf32>
    %29 = arith.maximumf %27, %28 : vector<512x64xf32>
    %30 = arith.truncf %29 : vector<512x64xf32> to vector<512x64xbf16>
    %c0_14 = arith.constant 0 : index
    %c0_15 = arith.constant 0 : index
    %31 = vector.load %arg5[%c0_14, %c0_15] : memref<512x64xbf16, #tpu.memory_space<vmem>>, vector<512x64xbf16>
    tpu.vector_store %arg5[%c0_14, %c0_15], %30 {strides = array<i32>} : memref<512x64xbf16, #tpu.memory_space<vmem>>, vector<512x64xbf16>,
    return
  }
  func.func @transform_0(%arg0: i32) -> (i32, i32) {
    %c0_i32 = arith.constant 0 : i32
    %c0_i32_0 = arith.constant 0 : i32
    %c0_i32_1 = arith.constant 0 : i32
    return %c0_i32, %c0_i32_0 : i32, i32
  }
  func.func @transform_1(%arg0: i32) -> (i32, i32) {
    %c0_i32 = arith.constant 0 : i32
    %c0_i32_0 = arith.constant 0 : i32
    return %c0_i32, %arg0 : i32, i32
  }
  func.func @transform_2(%arg0: i32) -> (i32, i32) {
    %c0_i32 = arith.constant 0 : i32
    %c0_i32_0 = arith.constant 0 : i32
    return %c0_i32, %arg0 : i32, i32
  }
  func.func @transform_3(%arg0: i32) -> (i32, i32) {
    %c0_i32 = arith.constant 0 : i32
    %c0_i32_0 = arith.constant 0 : i32
    return %c0_i32, %arg0 : i32, i32
  }
  func.func @transform_4(%arg0: i32) -> (i32, i32) {
    %c0_i32 = arith.constant 0 : i32
    %c0_i32_0 = arith.constant 0 : i32
    return %c0_i32, %arg0 : i32, i32
  }
}

</mosaic_0001>

<bundles_post_ra>
// kernel: tpu_custom_call.1
= control target key start
LH: loop header
LB: loop body
LE: loop exit
PB: predicated region body
PF: predicated region fallthrough
CT: control target
= control target key end

     0   :  { %v2071_v0 = vmov 0   ;;  %vm450_vm0 = vcmask 261120   ;;  %vm836_vm1 = vcmask 523264   ;;  %vm1639_vm2 = vcmask 519168   ;;  %s3849_s1 = inlined_call_operand.vmem [shape: bf16[160,64], index: 1, kind: input, shape index: {}]   ;;  %s3850_s0 = inlined_call_operand.vmem [shape: bf16[512,160], index: 0, kind: input, shape index: {}]   ;;  %s3851_s2 = inlined_call_operand.vmem [shape: f32[1,64], index: 2, kind: input, shape index: {}]   ;;  %s3852_s3 = inlined_call_operand.vmem [shape: f32[1,64], index: 3, kind: input, shape index: {}]   ;;  %s3853_s4 = inlined_call_operand.vmem [shape: bf16[512,64], index: 4, kind: output, shape index: {}]  }
   0x1   :  { %547 = vmatprep.subr.bf16.mxu0 %v2071_v0  ;;  %v1963_v1 = vld [vmem:[%s3849_s1] sm:$0xff]   ;;  %1942 = vmatprep.subr.bf16.mxu1 %v2071_v0  ;;  %v1964_v2 = vld [vmem:[%s3849_s1 + $0x8] sm:$0xff]   ;;  %v1965_v3 = vld [vmem:[%s3849_s1 + $0x10] sm:$0xff]  }
   0x2   :  { %548 = vmatpush1.bf16.msra.mxu0 %v1963_v1  ;;  %1952 = vmatpush1.bf16.msra.mxu1 %v1963_v1  ;;  %v1966_v4 = vld [vmem:[%s3849_s1 + $0x18] sm:$0xff]   ;;  %v1975_v5 = vld [vmem:[%s3850_s0 + $0x4] ss:$8 sps:$4 sm:$0xff]   ;;  %v1969_v9 = vld [vmem:[%s3849_s1 + $0x30] sm:$0xff]  }
   0x3   :  { %549 = vmatprep.subr.bf16.mxu0 %v2071_v0  ;;  %1943 = vmatprep.subr.bf16.mxu1 %v2071_v0  ;;  %v1967_v6 = vld [vmem:[%s3849_s1 + $0x20] sm:$0xff]   ;;  %v1968_v7 = vld [vmem:[%s3849_s1 + $0x28] sm:$0xff]   ;;  %v1970_v10 = vld [vmem:[%s3849_s1 + $0x38] sm:$0xff]  }
   0x4   :  { %1782 = vmatprep.mubr.msk.bf16.mxu0 %vm450_vm0, %v1975_v5  ;;  %v1999_v8 = vld [vmem:[%s3850_s0 + $0x104] ss:$8 sps:$4 sm:$0xff]   ;;  %v1973_v13 = vld [vmem:[%s3850_s0] ss:$8 sps:$4 sm:$0xff]   ;;  %v1976_v14 = vld [vmem:[%s3850_s0 + $0x14] ss:$8 sps:$4 sm:$0xff]  }
   0x5   :  { %1798 = vmatprep.mubr.msk.bf16.mxu1 %vm450_vm0, %v1999_v8  ;;  %v1971_v11 = vld [vmem:[%s3849_s1 + $0x40] sm:$0xff]   ;;  %v1972_v12 = vld [vmem:[%s3849_s1 + $0x48] sm:$0xff]   ;;  %v2003_v16 = vld [vmem:[%s3850_s0 + $0x114] ss:$8 sps:$4 sm:$0xff]  }
   0x6   :  { %550 = vmatpush1.bf16.msra.mxu0 %v1964_v2  ;;  %1953 = vmatpush1.bf16.msra.mxu1 %v1964_v2  ;;  %v1997_v15 = vld [vmem:[%s3850_s0 + $0x100] ss:$8 sps:$4 sm:$0xff]   ;;  %v1978_v17 = vld [vmem:[%s3850_s0 + $0x10] ss:$8 sps:$4 sm:$0xff]   ;;  %v1979_v18 = vld [vmem:[%s3850_s0 + $0x24] ss:$8 sps:$4 sm:$0xff]  }
   0x7   :  { %551 = vmatprep.subr.bf16.mxu0 %v2071_v0  ;;  %1944 = vmatprep.subr.bf16.mxu1 %v2071_v0  ;;  %v2005_v19 = vld [vmem:[%s3850_s0 + $0x110] ss:$8 sps:$4 sm:$0xff]   ;;  %v2009_v20 = vld [vmem:[%s3850_s0 + $0x124] ss:$8 sps:$4 sm:$0xff]   ;;  %v1981_v21 = vld [vmem:[%s3850_s0 + $0x20] ss:$8 sps:$4 sm:$0xff]  }
   0x8   :  { %v2011_v22 = vld [vmem:[%s3850_s0 + $0x120] ss:$8 sps:$4 sm:$0xff]   ;;  %v1982_v23 = vld [vmem:[%s3850_s0 + $0x34] ss:$8 sps:$4 sm:$0xff]   ;;  %v1984_v25 = vld [vmem:[%s3850_s0 + $0x30] ss:$8 sps:$4 sm:$0xff]  }
   0x9   :  { %v2015_v24 = vld [vmem:[%s3850_s0 + $0x134] ss:$8 sps:$4 sm:$0xff]   ;;  %v2017_v26 = vld [vmem:[%s3850_s0 + $0x130] ss:$8 sps:$4 sm:$0xff]   ;;  %v1985_v27 = vld [vmem:[%s3850_s0 + $0x44] ss:$8 sps:$4 sm:$0xff]  }
   0xa   :  { %552 = vmatpush1.bf16.msra.mxu0 %v1965_v3  ;;  %1954 = vmatpush1.bf16.msra.mxu1 %v1965_v3  ;;  %v2021_v28 = vld [vmem:[%s3850_s0 + $0x144] ss:$8 sps:$4 sm:$0xff]   ;;  %v1987_v29 = vld [vmem:[%s3850_s0 + $0x40] ss:$8 sps:$4 sm:$0xff]   ;;  %v1988_v31 = vld [vmem:[%s3850_s0 + $0x54] ss:$8 sps:$4 sm:$0xff]  }
   0xb   :  { %553 = vmatprep.subr.bf16.mxu0 %v2071_v0  ;;  %1945 = vmatprep.subr.bf16.mxu1 %v2071_v0  ;;  %v2023_v30 = vld [vmem:[%s3850_s0 + $0x140] ss:$8 sps:$4 sm:$0xff]   ;;  %v2027_v32 = vld [vmem:[%s3850_s0 + $0x154] ss:$8 sps:$4 sm:$0xff]   ;;  %v1990_v33 = vld [vmem:[%s3850_s0 + $0x50] ss:$8 sps:$4 sm:$0xff]  }
   0xc   :  { %v2029_v34 = vld [vmem:[%s3850_s0 + $0x150] ss:$8 sps:$4 sm:$0xff]   ;;  %v1991_v35 = vld [vmem:[%s3850_s0 + $0x64] ss:$8 sps:$4 sm:$0xff]   ;;  %v1993_v37 = vld [vmem:[%s3850_s0 + $0x60] ss:$8 sps:$4 sm:$0xff]  }
   0xd   :  { %v2033_v36 = vld [vmem:[%s3850_s0 + $0x164] ss:$8 sps:$4 sm:$0xff]   ;;  %v2035_v38 = vld [vmem:[%s3850_s0 + $0x160] ss:$8 sps:$4 sm:$0xff]   ;;  %v1994_v39 = vld [vmem:[%s3850_s0 + $0x74] ss:$8 sps:$4 sm:$0xff]  }
   0xe   :  { %554 = vmatpush1.bf16.msra.mxu0 %v1966_v4  ;;  %1955 = vmatpush1.bf16.msra.mxu1 %v1966_v4  ;;  %v2039_v40 = vld [vmem:[%s3850_s0 + $0x174] ss:$8 sps:$4 sm:$0xff]   ;;  %v1996_v41 = vld [vmem:[%s3850_s0 + $0x70] ss:$8 sps:$4 sm:$0xff]   ;;  %v2000_v43 = vld [vmem:[%s3850_s0 + $0x84] ss:$8 sps:$4 sm:$0xff]  }
   0xf   :  { %555 = vmatprep.subr.bf16.mxu0 %v2071_v0  ;;  %1946 = vmatprep.subr.bf16.mxu1 %v2071_v0  ;;  %v2041_v42 = vld [vmem:[%s3850_s0 + $0x170] ss:$8 sps:$4 sm:$0xff]   ;;  %v2045_v44 = vld [vmem:[%s3850_s0 + $0x184] ss:$8 sps:$4 sm:$0xff]   ;;  %v2002_v45 = vld [vmem:[%s3850_s0 + $0x80] ss:$8 sps:$4 sm:$0xff]  }
  0x10   :  { %v2047_v46 = vld [vmem:[%s3850_s0 + $0x180] ss:$8 sps:$4 sm:$0xff]   ;;  %v2006_v47 = vld [vmem:[%s3850_s0 + $0x94] ss:$8 sps:$4 sm:$0xff]   ;;  %v2008_v49 = vld [vmem:[%s3850_s0 + $0x90] ss:$8 sps:$4 sm:$0xff]  }
  0x11   :  { %v2048_v48 = vld [vmem:[%s3850_s0 + $0x194] ss:$8 sps:$4 sm:$0xff]   ;;  %v2050_v50 = vld [vmem:[%s3850_s0 + $0x190] ss:$8 sps:$4 sm:$0xff]   ;;  %v2012_v51 = vld [vmem:[%s3850_s0 + $0xa4] ss:$8 sps:$4 sm:$0xff]  }
  0x12   :  { %556 = vmatpush1.bf16.msra.mxu0 %v1967_v6  ;;  %1956 = vmatpush1.bf16.msra.mxu1 %v1967_v6  ;;  %v2051_v52 = vld [vmem:[%s3850_s0 + $0x1a4] ss:$8 sps:$4 sm:$0xff]   ;;  %v2014_v53 = vld [vmem:[%s3850_s0 + $0xa0] ss:$8 sps:$4 sm:$0xff]   ;;  %v2018_v55 = vld [vmem:[%s3850_s0 + $0xb4] ss:$8 sps:$4 sm:$0xff]  }
  0x13   :  { %557 = vmatprep.subr.bf16.mxu0 %v2071_v0  ;;  %1947 = vmatprep.subr.bf16.mxu1 %v2071_v0  ;;  %v2053_v54 = vld [vmem:[%s3850_s0 + $0x1a0] ss:$8 sps:$4 sm:$0xff]   ;;  %v2054_v56 = vld [vmem:[%s3850_s0 + $0x1b4] ss:$8 sps:$4 sm:$0xff]   ;;  %v2020_v57 = vld [vmem:[%s3850_s0 + $0xb0] ss:$8 sps:$4 sm:$0xff]  }
  0x14   :  { %v2056_v58 = vld [vmem:[%s3850_s0 + $0x1b0] ss:$8 sps:$4 sm:$0xff]   ;;  %v2024_v59 = vld [vmem:[%s3850_s0 + $0xc4] ss:$8 sps:$4 sm:$0xff]   ;;  %v2026_v61 = vld [vmem:[%s3850_s0 + $0xc0] ss:$8 sps:$4 sm:$0xff]  }
  0x15   :  { %v2057_v60 = vld [vmem:[%s3850_s0 + $0x1c4] ss:$8 sps:$4 sm:$0xff]   ;;  %v2059_v62 = vld [vmem:[%s3850_s0 + $0x1c0] ss:$8 sps:$4 sm:$0xff]   ;;  %v2030_v63 = vld [vmem:[%s3850_s0 + $0xd4] ss:$8 sps:$4 sm:$0xff]  }
  0x16   :  { %558 = vmatpush1.bf16.msra.mxu0 %v1968_v7  ;;  %1957 = vmatpush1.bf16.msra.mxu1 %v1968_v7  ;;  %v2032_v1 = vld [vmem:[%s3850_s0 + $0xd0] ss:$8 sps:$4 sm:$0xff]   ;;  %v2036_v3 = vld [vmem:[%s3850_s0 + $0xe4] ss:$8 sps:$4 sm:$0xff]   ;;  %v2038_v5 = vld [vmem:[%s3850_s0 + $0xe0] ss:$8 sps:$4 sm:$0xff]  }
  0x17   :  { %559 = vmatprep.subr.bf16.mxu0 %v2071_v0  ;;  %1948 = vmatprep.subr.bf16.mxu1 %v2071_v0  ;;  %v2062_v2 = vld [vmem:[%s3850_s0 + $0x1d0] ss:$8 sps:$4 sm:$0xff]   ;;  %v2063_v4 = vld [vmem:[%s3850_s0 + $0x1e4] ss:$8 sps:$4 sm:$0xff]   ;;  %v2065_v6 = vld [vmem:[%s3850_s0 + $0x1e0] ss:$8 sps:$4 sm:$0xff]  }
  0x18   :  { %v2042_v7 = vld [vmem:[%s3850_s0 + $0xf4] ss:$8 sps:$4 sm:$0xff]  }
  0x19   :  { %v2066_v8 = vld [vmem:[%s3850_s0 + $0x1f4] ss:$8 sps:$4 sm:$0xff]  }
  0x1a   :  { %560 = vmatpush1.bf16.msra.mxu0 %v1969_v9  ;;  %1958 = vmatpush1.bf16.msra.mxu1 %v1969_v9  ;;  %v2044_v9 = vld [vmem:[%s3850_s0 + $0xf0] ss:$8 sps:$4 sm:$0xff]  }
  0x1b   :  { %561 = vmatprep.subr.bf16.mxu0 %v2071_v0  ;;  %1949 = vmatprep.subr.bf16.mxu1 %v2071_v0 }
  0x1e   :  { %562 = vmatpush1.bf16.msra.mxu0 %v1970_v10  ;;  %1959 = vmatpush1.bf16.msra.mxu1 %v1970_v10  ;;  %v2068_v10 = vld [vmem:[%s3850_s0 + $0x1f0] ss:$8 sps:$4 sm:$0xff]  }
  0x1f   :  { %563 = vmatprep.subr.bf16.mxu0 %v2071_v0  ;;  %1950 = vmatprep.subr.bf16.mxu1 %v2071_v0 }
  0x22   :  { %564 = vmatpush1.bf16.msra.mxu0 %v1971_v11  ;;  %1960 = vmatpush1.bf16.msra.mxu1 %v1971_v11 }
  0x23   :  { %565 = vmatprep.subr.bf16.mxu0 %v2071_v0  ;;  %1951 = vmatprep.subr.bf16.mxu1 %v2071_v0  ;;  %v2060_v0 = vld [vmem:[%s3850_s0 + $0x1d4] ss:$8 sps:$4 sm:$0xff]  }
  0x26   :  { %566 = vmatpush1.bf16.msra.mxu0 %v1972_v12  ;;  %1961 = vmatpush1.bf16.msra.mxu1 %v1972_v12 }
  0x29   :  { %580 = vmatmul.mubr.bf16.vlgmr.msra.gmra.mrb[0].mxu0 %v1973_v13  ;;  %708 = vmatmul.mubr.bf16.vlgmr.msra.gmra.mrb[0].mxu1 %v1997_v15 }
  0x2a   :  { %1783 = vmatprep.mubr.msk.bf16.mxu0 %vm450_vm0, %v1976_v14  ;;  %1799 = vmatprep.mubr.msk.bf16.mxu1 %vm450_vm0, %v2003_v16 }
  0x31   :  { %588 = vmatmul.mubr.bf16.gmra.mrb[4].mxu0 %v1978_v17  ;;  %716 = vmatmul.mubr.bf16.gmra.mrb[4].mxu1 %v2005_v19 }
  0x32   :  { %1784 = vmatprep.mubr.msk.bf16.mxu0 %vm450_vm0, %v1979_v18  ;;  %1800 = vmatprep.mubr.msk.bf16.mxu1 %vm450_vm0, %v2009_v20 }
  0x39   :  { %596 = vmatmul.mubr.bf16.gmra.mrb[8].mxu0 %v1981_v21  ;;  %724 = vmatmul.mubr.bf16.gmra.mrb[8].mxu1 %v2011_v22 }
  0x3a   :  { %1785 = vmatprep.mubr.msk.bf16.mxu0 %vm450_vm0, %v1982_v23  ;;  %1801 = vmatprep.mubr.msk.bf16.mxu1 %vm450_vm0, %v2015_v24 }
  0x41   :  { %604 = vmatmul.mubr.bf16.gmra.mrb[12].mxu0 %v1984_v25  ;;  %732 = vmatmul.mubr.bf16.gmra.mrb[12].mxu1 %v2017_v26 }
  0x42   :  { %1786 = vmatprep.mubr.msk.bf16.mxu0 %vm450_vm0, %v1985_v27  ;;  %1802 = vmatprep.mubr.msk.bf16.mxu1 %vm450_vm0, %v2021_v28 }
  0x49   :  { %612 = vmatmul.mubr.bf16.gmra.mrb[16].mxu0 %v1987_v29  ;;  %740 = vmatmul.mubr.bf16.gmra.mrb[16].mxu1 %v2023_v30 }
  0x4a   :  { %1787 = vmatprep.mubr.msk.bf16.mxu0 %vm450_vm0, %v1988_v31  ;;  %1803 = vmatprep.mubr.msk.bf16.mxu1 %vm450_vm0, %v2027_v32 }
  0x51   :  { %620 = vmatmul.mubr.bf16.gmra.mrb[20].mxu0 %v1990_v33  ;;  %748 = vmatmul.mubr.bf16.gmra.mrb[20].mxu1 %v2029_v34 }
  0x52   :  { %1788 = vmatprep.mubr.msk.bf16.mxu0 %vm450_vm0, %v1991_v35  ;;  %1804 = vmatprep.mubr.msk.bf16.mxu1 %vm450_vm0, %v2033_v36 }
  0x59   :  { %628 = vmatmul.mubr.bf16.gmra.mrb[24].mxu0 %v1993_v37  ;;  %756 = vmatmul.mubr.bf16.gmra.mrb[24].mxu1 %v2035_v38 }
  0x5a   :  { %1789 = vmatprep.mubr.msk.bf16.mxu0 %vm450_vm0, %v1994_v39  ;;  %1805 = vmatprep.mubr.msk.bf16.mxu1 %vm450_vm0, %v2039_v40 }
  0x61   :  { %636 = vmatmul.mubr.bf16.gmra.mrb[28].mxu0 %v1996_v41  ;;  %764 = vmatmul.mubr.bf16.gmra.mrb[28].mxu1 %v2041_v42 }
  0x62   :  { %1790 = vmatprep.mubr.msk.bf16.mxu0 %vm450_vm0, %v2000_v43  ;;  %1806 = vmatprep.mubr.msk.bf16.mxu1 %vm450_vm0, %v2045_v44 }
  0x69   :  { %644 = vmatmul.mubr.bf16.gmra.mrb[32].mxu0 %v2002_v45  ;;  %772 = vmatmul.mubr.bf16.gmra.mrb[32].mxu1 %v2047_v46 }
  0x6a   :  { %1791 = vmatprep.mubr.msk.bf16.mxu0 %vm450_vm0, %v2006_v47  ;;  %1807 = vmatprep.mubr.msk.bf16.mxu1 %vm450_vm0, %v2048_v48 }
  0x71   :  { %652 = vmatmul.mubr.bf16.gmra.mrb[36].mxu0 %v2008_v49  ;;  %780 = vmatmul.mubr.bf16.gmra.mrb[36].mxu1 %v2050_v50 }
  0x72   :  { %1792 = vmatprep.mubr.msk.bf16.mxu0 %vm450_vm0, %v2012_v51  ;;  %1808 = vmatprep.mubr.msk.bf16.mxu1 %vm450_vm0, %v2051_v52 }
  0x79   :  { %660 = vmatmul.mubr.bf16.gmra.mrb[40].mxu0 %v2014_v53  ;;  %788 = vmatmul.mubr.bf16.gmra.mrb[40].mxu1 %v2053_v54 }
  0x7a   :  { %1793 = vmatprep.mubr.msk.bf16.mxu0 %vm450_vm0, %v2018_v55  ;;  %1809 = vmatprep.mubr.msk.bf16.mxu1 %vm450_vm0, %v2054_v56 }
  0x81   :  { %668 = vmatmul.mubr.bf16.gmra.mrb[44].mxu0 %v2020_v57  ;;  %796 = vmatmul.mubr.bf16.gmra.mrb[44].mxu1 %v2056_v58 }
  0x82   :  { %1794 = vmatprep.mubr.msk.bf16.mxu0 %vm450_vm0, %v2024_v59  ;;  %1810 = vmatprep.mubr.msk.bf16.mxu1 %vm450_vm0, %v2057_v60 }
  0x89   :  { %676 = vmatmul.mubr.bf16.gmra.mrb[48].mxu0 %v2026_v61  ;;  %804 = vmatmul.mubr.bf16.gmra.mrb[48].mxu1 %v2059_v62 }
  0x8a   :  { %1795 = vmatprep.mubr.msk.bf16.mxu0 %vm450_vm0, %v2030_v63  ;;  %1811 = vmatprep.mubr.msk.bf16.mxu1 %vm450_vm0, %v2060_v0 }
  0x91   :  { %684 = vmatmul.mubr.bf16.gmra.mrb[52].mxu0 %v2032_v1  ;;  %812 = vmatmul.mubr.bf16.gmra.mrb[52].mxu1 %v2062_v2 }
  0x92   :  { %1796 = vmatprep.mubr.msk.bf16.mxu0 %vm450_vm0, %v2036_v3  ;;  %1812 = vmatprep.mubr.msk.bf16.mxu1 %vm450_vm0, %v2063_v4 }
  0x99   :  { %692 = vmatmul.mubr.bf16.gmra.mrb[56].mxu0 %v2038_v5  ;;  %820 = vmatmul.mubr.bf16.gmra.mrb[56].mxu1 %v2065_v6 }
  0x9a   :  { %1797 = vmatprep.mubr.msk.bf16.mxu0 %vm450_vm0, %v2042_v7  ;;  %1813 = vmatprep.mubr.msk.bf16.mxu1 %vm450_vm0, %v2066_v8 }
  0xa1   :  { %700 = vmatmul.mubr.bf16.gmra.mrb[60].mxu0 %v2044_v9  ;;  %828 = vmatmul.mubr.bf16.gmra.mrb[60].mxu1 %v2068_v10 }
  0xfc   :  { %v2351_v11 = vpop.f32.mrb[0].mxu0  ;;  %v2353_v12 = vpop.f32.mrb[0].mxu1 }
  0xfd   :  { %v970_v13 = vmul.f32 %v2351_v11, %v2351_v11  ;;  %v583_v14 = vpop.f32.mrb[1].mxu0  ;;  %v711_v15 = vpop.f32.mrb[1].mxu1  ;;  %v837_v18 = vsel %vm836_vm1, %v2351_v11, 0.0 }
  0xfe   :  { %v2357_v16 = vpop.f32.mrb[2].mxu0  ;;  %v2359_v17 = vpop.f32.mrb[2].mxu1 }
  0xff   :  { %v838_v19 = vsel %vm836_vm1, %v2357_v16, 0.0  ;;  %v971_v20 = vmul.f32 %v2357_v16, %v2357_v16  ;;  %v586_v21 = vpop.f32.mrb[3].mxu0  ;;  %v714_v22 = vpop.f32.mrb[3].mxu1  ;;  %v1034_v24 = vsel %vm836_vm1, %v970_v13, 0.0 }
 0x100   :  { %v839_v23 = vadd.f32 %v838_v19, %v837_v18 }
 0x101   :  { %v1035_v25 = vsel %vm836_vm1, %v971_v20, 0.0 }
 0x102   :  { %v1036_v26 = vadd.f32 %v1035_v25, %v1034_v24 }
 0x104   :  { %v2369_v27 = vpop.f32.mrb[4].mxu0  ;;  %v2371_v28 = vpop.f32.mrb[4].mxu1 }
 0x105   :  { %v840_v29 = vsel %vm836_vm1, %v2369_v27, 0.0  ;;  %v972_v30 = vmul.f32 %v2369_v27, %v2369_v27  ;;  %v591_v31 = vpop.f32.mrb[5].mxu0  ;;  %v719_v32 = vpop.f32.mrb[5].mxu1 }
 0x106   :  { %v841_v33 = vadd.f32 %v840_v29, %v839_v23  ;;  %v2377_v34 = vpop.f32.mrb[6].mxu0  ;;  %v2379_v35 = vpop.f32.mrb[6].mxu1 }
 0x107   :  { %v1037_v36 = vsel %vm836_vm1, %v972_v30, 0.0  ;;  %v842_v37 = vsel %vm836_vm1, %v2377_v34, 0.0  ;;  %v973_v38 = vmul.f32 %v2377_v34, %v2377_v34  ;;  %v594_v39 = vpop.f32.mrb[7].mxu0  ;;  %v722_v40 = vpop.f32.mrb[7].mxu1 }
 0x108   :  { %v1038_v41 = vadd.f32 %v1037_v36, %v1036_v26  ;;  %v843_v42 = vadd.f32 %v842_v37, %v841_v33 }
 0x109   :  { %v1039_v43 = vsel %vm836_vm1, %v973_v38, 0.0 }
 0x10a   :  { %v1040_v44 = vadd.f32 %v1039_v43, %v1038_v41 }
 0x10c   :  { %v2387_v45 = vpop.f32.mrb[8].mxu0  ;;  %v2389_v46 = vpop.f32.mrb[8].mxu1 }
 0x10d   :  { %v844_v47 = vsel %vm836_vm1, %v2387_v45, 0.0  ;;  %v974_v48 = vmul.f32 %v2387_v45, %v2387_v45  ;;  %v599_v49 = vpop.f32.mrb[9].mxu0  ;;  %v727_v50 = vpop.f32.mrb[9].mxu1 }
 0x10e   :  { %v845_v51 = vadd.f32 %v844_v47, %v843_v42  ;;  %v2395_v52 = vpop.f32.mrb[10].mxu0  ;;  %v2397_v53 = vpop.f32.mrb[10].mxu1 }
 0x10f   :  { %v1041_v54 = vsel %vm836_vm1, %v974_v48, 0.0  ;;  %v846_v55 = vsel %vm836_vm1, %v2395_v52, 0.0  ;;  %v975_v56 = vmul.f32 %v2395_v52, %v2395_v52  ;;  %v602_v57 = vpop.f32.mrb[11].mxu0  ;;  %v730_v58 = vpop.f32.mrb[11].mxu1 }
 0x110   :  { %v1042_v59 = vadd.f32 %v1041_v54, %v1040_v44  ;;  %v847_v60 = vadd.f32 %v846_v55, %v845_v51 }
 0x111   :  { %v1043_v61 = vsel %vm836_vm1, %v975_v56, 0.0 }
 0x112   :  { %v1044_v62 = vadd.f32 %v1043_v61, %v1042_v59 }
 0x114   :  { %v2405_v63 = vpop.f32.mrb[12].mxu0  ;;  %v2407_v0 = vpop.f32.mrb[12].mxu1 }
 0x115   :  { %v848_v1 = vsel %vm836_vm1, %v2405_v63, 0.0  ;;  %v976_v2 = vmul.f32 %v2405_v63, %v2405_v63  ;;  %v607_v3 = vpop.f32.mrb[13].mxu0  ;;  %v735_v4 = vpop.f32.mrb[13].mxu1 }
 0x116   :  { %v849_v5 = vadd.f32 %v848_v1, %v847_v60  ;;  %v2413_v6 = vpop.f32.mrb[14].mxu0  ;;  %v2415_v7 = vpop.f32.mrb[14].mxu1 }
 0x117   :  { %v1045_v8 = vsel %vm836_vm1, %v976_v2, 0.0  ;;  %v850_v9 = vsel %vm836_vm1, %v2413_v6, 0.0  ;;  %v977_v10 = vmul.f32 %v2413_v6, %v2413_v6  ;;  %v610_v13 = vpop.f32.mrb[15].mxu0  ;;  %v738_v14 = vpop.f32.mrb[15].mxu1 }
 0x118   :  { %v1046_v15 = vadd.f32 %v1045_v8, %v1044_v62  ;;  %v851_v18 = vadd.f32 %v850_v9, %v849_v5 }
 0x119   :  { %v1047_v19 = vsel %vm836_vm1, %v977_v10, 0.0 }
 0x11a   :  { %v1048_v20 = vadd.f32 %v1047_v19, %v1046_v15 }
 0x11c   :  { %v2423_v21 = vpop.f32.mrb[16].mxu0  ;;  %v2425_v22 = vpop.f32.mrb[16].mxu1 }
 0x11d   :  { %v852_v23 = vsel %vm836_vm1, %v2423_v21, 0.0  ;;  %v978_v24 = vmul.f32 %v2423_v21, %v2423_v21  ;;  %v615_v25 = vpop.f32.mrb[17].mxu0  ;;  %v743_v26 = vpop.f32.mrb[17].mxu1 }
 0x11e   :  { %v853_v29 = vadd.f32 %v852_v23, %v851_v18  ;;  %v2431_v30 = vpop.f32.mrb[18].mxu0  ;;  %v2433_v31 = vpop.f32.mrb[18].mxu1 }
 0x11f   :  { %v1049_v32 = vsel %vm836_vm1, %v978_v24, 0.0  ;;  %v854_v33 = vsel %vm836_vm1, %v2431_v30, 0.0  ;;  %v979_v36 = vmul.f32 %v2431_v30, %v2431_v30  ;;  %v618_v37 = vpop.f32.mrb[19].mxu0  ;;  %v746_v38 = vpop.f32.mrb[19].mxu1 }
 0x120   :  { %v1050_v39 = vadd.f32 %v1049_v32, %v1048_v20  ;;  %v855_v40 = vadd.f32 %v854_v33, %v853_v29 }
 0x121   :  { %v1051_v41 = vsel %vm836_vm1, %v979_v36, 0.0 }
 0x122   :  { %v1052_v42 = vadd.f32 %v1051_v41, %v1050_v39 }
 0x124   :  { %v2441_v43 = vpop.f32.mrb[20].mxu0  ;;  %v2443_v44 = vpop.f32.mrb[20].mxu1 }
 0x125   :  { %v856_v47 = vsel %vm836_vm1, %v2441_v43, 0.0  ;;  %v980_v48 = vmul.f32 %v2441_v43, %v2441_v43  ;;  %v623_v49 = vpop.f32.mrb[21].mxu0  ;;  %v751_v50 = vpop.f32.mrb[21].mxu1 }
 0x126   :  { %v857_v51 = vadd.f32 %v856_v47, %v855_v40  ;;  %v2449_v54 = vpop.f32.mrb[22].mxu0  ;;  %v2451_v55 = vpop.f32.mrb[22].mxu1 }
 0x127   :  { %v1053_v56 = vsel %vm836_vm1, %v980_v48, 0.0  ;;  %v858_v57 = vsel %vm836_vm1, %v2449_v54, 0.0  ;;  %v981_v58 = vmul.f32 %v2449_v54, %v2449_v54  ;;  %v626_v59 = vpop.f32.mrb[23].mxu0  ;;  %v754_v60 = vpop.f32.mrb[23].mxu1 }
 0x128   :  { %v1054_v61 = vadd.f32 %v1053_v56, %v1052_v42  ;;  %v859_v62 = vadd.f32 %v858_v57, %v857_v51 }
 0x129   :  { %v1055_v1 = vsel %vm836_vm1, %v981_v58, 0.0 }
 0x12a   :  { %v1056_v2 = vadd.f32 %v1055_v1, %v1054_v61 }
 0x12c   :  { %v2459_v3 = vpop.f32.mrb[24].mxu0  ;;  %v2461_v4 = vpop.f32.mrb[24].mxu1 }
 0x12d   :  { %v860_v5 = vsel %vm836_vm1, %v2459_v3, 0.0  ;;  %v982_v8 = vmul.f32 %v2459_v3, %v2459_v3  ;;  %v631_v9 = vpop.f32.mrb[25].mxu0  ;;  %v759_v10 = vpop.f32.mrb[25].mxu1 }
 0x12e   :  { %v861_v13 = vadd.f32 %v860_v5, %v859_v62  ;;  %v2467_v14 = vpop.f32.mrb[26].mxu0  ;;  %v2469_v15 = vpop.f32.mrb[26].mxu1 }
 0x12f   :  { %v1057_v18 = vsel %vm836_vm1, %v982_v8, 0.0  ;;  %v862_v19 = vsel %vm836_vm1, %v2467_v14, 0.0  ;;  %v983_v20 = vmul.f32 %v2467_v14, %v2467_v14  ;;  %v634_v23 = vpop.f32.mrb[27].mxu0  ;;  %v762_v24 = vpop.f32.mrb[27].mxu1 }
 0x130   :  { %v1058_v25 = vadd.f32 %v1057_v18, %v1056_v2  ;;  %v863_v26 = vadd.f32 %v862_v19, %v861_v13 }
 0x131   :  { %v1059_v29 = vsel %vm836_vm1, %v983_v20, 0.0 }
 0x132   :  { %v1060_v32 = vadd.f32 %v1059_v29, %v1058_v25 }
 0x134   :  { %v2477_v33 = vpop.f32.mrb[28].mxu0  ;;  %v2479_v36 = vpop.f32.mrb[28].mxu1 }
 0x135   :  { %3896 = vst [vmem:[#allocation2_spill] sm:$0xff] %v2477_v33  ;;  %v864_v37 = vsel %vm836_vm1, %v2477_v33, 0.0  ;;  %v984_v38 = vmul.f32 %v2477_v33, %v2477_v33  ;;  %v639_v39 = vpop.f32.mrb[29].mxu0  ;;  %v767_v40 = vpop.f32.mrb[29].mxu1  ;;  %v902_v33 = vsel %vm836_vm1, %v2359_v17, 0.0 }
 0x136   :  { %v865_v41 = vadd.f32 %v864_v37, %v863_v26  ;;  %v2485_v42 = vpop.f32.mrb[30].mxu0  ;;  %v2487_v47 = vpop.f32.mrb[30].mxu1 }
 0x137   :  { %3897 = vst [vmem:[#allocation3_spill] sm:$0xff] %v2485_v42  ;;  %v1061_v48 = vsel %vm836_vm1, %v984_v38, 0.0  ;;  %v866_v49 = vsel %vm836_vm1, %v2485_v42, 0.0  ;;  %v985_v50 = vmul.f32 %v2485_v42, %v2485_v42  ;;  %v642_v51 = vpop.f32.mrb[31].mxu0  ;;  %v770_v56 = vpop.f32.mrb[31].mxu1 }
 0x138   :  { %v1062_v57 = vadd.f32 %v1061_v48, %v1060_v32  ;;  %v867_v58 = vadd.f32 %v866_v49, %v865_v41 }
 0x139   :  { %v1063_v59 = vsel %vm836_vm1, %v985_v50, 0.0 }
 0x13a   :  { %v1064_v60 = vadd.f32 %v1063_v59, %v1062_v57 }
 0x13c   :  { %v2495_v61 = vpop.f32.mrb[32].mxu0  ;;  %v2497_v62 = vpop.f32.mrb[32].mxu1 }
 0x13d   :  { %3898 = vst [vmem:[#allocation4_spill] sm:$0xff] %v2495_v61  ;;  %v868_v1 = vsel %vm836_vm1, %v2495_v61, 0.0  ;;  %v986_v2 = vmul.f32 %v2495_v61, %v2495_v61  ;;  %v647_v5 = vpop.f32.mrb[33].mxu0  ;;  %v775_v8 = vpop.f32.mrb[33].mxu1 }
 0x13e   :  { %v869_v9 = vadd.f32 %v868_v1, %v867_v58  ;;  %v2503_v10 = vpop.f32.mrb[34].mxu0  ;;  %v2505_v13 = vpop.f32.mrb[34].mxu1 }
 0x13f   :  { %3899 = vst [vmem:[#allocation5_spill] sm:$0xff] %v2503_v10  ;;  %v1065_v18 = vsel %vm836_vm1, %v986_v2, 0.0  ;;  %v870_v19 = vsel %vm836_vm1, %v2503_v10, 0.0  ;;  %v987_v20 = vmul.f32 %v2503_v10, %v2503_v10  ;;  %v650_v23 = vpop.f32.mrb[35].mxu0  ;;  %v778_v24 = vpop.f32.mrb[35].mxu1 }
 0x140   :  { %v1066_v25 = vadd.f32 %v1065_v18, %v1064_v60  ;;  %v871_v26 = vadd.f32 %v870_v19, %v869_v9 }
 0x141   :  { %v1067_v29 = vsel %vm836_vm1, %v987_v20, 0.0 }
 0x142   :  { %v1068_v32 = vadd.f32 %v1067_v29, %v1066_v25 }
 0x144   :  { %v2513_v37 = vpop.f32.mrb[36].mxu0  ;;  %v2515_v38 = vpop.f32.mrb[36].mxu1 }
 0x145   :  { %3900 = vst [vmem:[#allocation6_spill] sm:$0xff] %v2513_v37  ;;  %v872_v39 = vsel %vm836_vm1, %v2513_v37, 0.0  ;;  %v988_v40 = vmul.f32 %v2513_v37, %v2513_v37  ;;  %v655_v41 = vpop.f32.mrb[37].mxu0  ;;  %v783_v48 = vpop.f32.mrb[37].mxu1 }
 0x146   :  { %v873_v49 = vadd.f32 %v872_v39, %v871_v26  ;;  %v2521_v50 = vpop.f32.mrb[38].mxu0  ;;  %v2523_v51 = vpop.f32.mrb[38].mxu1 }
 0x147   :  { %3901 = vst [vmem:[#allocation7_spill] sm:$0xff] %v2521_v50  ;;  %v1069_v56 = vsel %vm836_vm1, %v988_v40, 0.0  ;;  %v874_v57 = vsel %vm836_vm1, %v2521_v50, 0.0  ;;  %v989_v58 = vmul.f32 %v2521_v50, %v2521_v50  ;;  %v658_v59 = vpop.f32.mrb[39].mxu0  ;;  %v786_v60 = vpop.f32.mrb[39].mxu1 }
 0x148   :  { %v1070_v1 = vadd.f32 %v1069_v56, %v1068_v32  ;;  %v875_v2 = vadd.f32 %v874_v57, %v873_v49 }
 0x149   :  { %v1071_v5 = vsel %vm836_vm1, %v989_v58, 0.0 }
 0x14a   :  { %v1072_v8 = vadd.f32 %v1071_v5, %v1070_v1 }
 0x14c   :  { %v2531_v9 = vpop.f32.mrb[40].mxu0  ;;  %v2533_v18 = vpop.f32.mrb[40].mxu1 }
 0x14d   :  { %3902 = vst [vmem:[#allocation8_spill] sm:$0xff] %v2531_v9  ;;  %v876_v19 = vsel %vm836_vm1, %v2531_v9, 0.0  ;;  %v990_v20 = vmul.f32 %v2531_v9, %v2531_v9  ;;  %v663_v23 = vpop.f32.mrb[41].mxu0  ;;  %v791_v24 = vpop.f32.mrb[41].mxu1 }
 0x14e   :  { %v877_v25 = vadd.f32 %v876_v19, %v875_v2  ;;  %v2539_v26 = vpop.f32.mrb[42].mxu0  ;;  %v2541_v29 = vpop.f32.mrb[42].mxu1 }
 0x14f   :  { %3903 = vst [vmem:[#allocation9_spill] sm:$0xff] %v2539_v26  ;;  %v1073_v32 = vsel %vm836_vm1, %v990_v20, 0.0  ;;  %v878_v39 = vsel %vm836_vm1, %v2539_v26, 0.0  ;;  %v991_v40 = vmul.f32 %v2539_v26, %v2539_v26  ;;  %v666_v41 = vpop.f32.mrb[43].mxu0  ;;  %v794_v48 = vpop.f32.mrb[43].mxu1 }
 0x150   :  { %v1074_v49 = vadd.f32 %v1073_v32, %v1072_v8  ;;  %v879_v56 = vadd.f32 %v878_v39, %v877_v25 }
 0x151   :  { %v1075_v57 = vsel %vm836_vm1, %v991_v40, 0.0 }
 0x152   :  { %v1076_v58 = vadd.f32 %v1075_v57, %v1074_v49 }
 0x154   :  { %v2549_v59 = vpop.f32.mrb[44].mxu0  ;;  %v2551_v60 = vpop.f32.mrb[44].mxu1 }
 0x155   :  { %3904 = vst [vmem:[#allocation10_spill] sm:$0xff] %v2549_v59  ;;  %v880_v1 = vsel %vm836_vm1, %v2549_v59, 0.0  ;;  %v992_v2 = vmul.f32 %v2549_v59, %v2549_v59  ;;  %v671_v5 = vpop.f32.mrb[45].mxu0  ;;  %v799_v19 = vpop.f32.mrb[45].mxu1 }
 0x156   :  { %v881_v20 = vadd.f32 %v880_v1, %v879_v56  ;;  %v2557_v23 = vpop.f32.mrb[46].mxu0  ;;  %v2559_v8 = vpop.f32.mrb[46].mxu1 }
 0x157   :  { %3905 = vst [vmem:[#allocation11_spill] sm:$0xff] %v2557_v23  ;;  %v1077_v24 = vsel %vm836_vm1, %v992_v2, 0.0  ;;  %v882_v25 = vsel %vm836_vm1, %v2557_v23, 0.0  ;;  %v993_v32 = vmul.f32 %v2557_v23, %v2557_v23  ;;  %v674_v39 = vpop.f32.mrb[47].mxu0  ;;  %v802_v40 = vpop.f32.mrb[47].mxu1 }
 0x158   :  { %v1078_v41 = vadd.f32 %v1077_v24, %v1076_v58  ;;  %v883_v48 = vadd.f32 %v882_v25, %v881_v20 }
 0x159   :  { %v1079_v49 = vsel %vm836_vm1, %v993_v32, 0.0 }
 0x15a   :  { %v1080_v57 = vadd.f32 %v1079_v49, %v1078_v41 }
 0x15c   :  { %v2567_v56 = vpop.f32.mrb[48].mxu0  ;;  %v2569_v1 = vpop.f32.mrb[48].mxu1 }
 0x15d   :  { %3906 = vst [vmem:[#allocation12_spill] sm:$0xff] %v2567_v56  ;;  %v884_v2 = vsel %vm836_vm1, %v2567_v56, 0.0  ;;  %v994_v5 = vmul.f32 %v2567_v56, %v2567_v56  ;;  %v679_v19 = vpop.f32.mrb[49].mxu0  ;;  %v807_v59 = vpop.f32.mrb[49].mxu1 }
 0x15e   :  { %v885_v23 = vadd.f32 %v884_v2, %v883_v48  ;;  %v2575_v39 = vpop.f32.mrb[50].mxu0  ;;  %v2577_v58 = vpop.f32.mrb[50].mxu1 }
 0x15f   :  { %3907 = vst [vmem:[#allocation13_spill] sm:$0xff] %v2575_v39  ;;  %3908 = vst [vmem:[#allocation14_spill] sm:$0xff] %v2577_v58  ;;  %v1081_v20 = vsel %vm836_vm1, %v994_v5, 0.0  ;;  %v886_v24 = vsel %vm836_vm1, %v2575_v39, 0.0  ;;  %v995_v25 = vmul.f32 %v2575_v39, %v2575_v39  ;;  %v682_v32 = vpop.f32.mrb[51].mxu0  ;;  %v810_v40 = vpop.f32.mrb[51].mxu1 }
 0x160   :  { %v1082_v41 = vadd.f32 %v1081_v20, %v1080_v57  ;;  %v887_v49 = vadd.f32 %v886_v24, %v885_v23 }
 0x161   :  { %v1083_v19 = vsel %vm836_vm1, %v995_v25, 0.0 }
 0x162   :  { %v1084_v59 = vadd.f32 %v1083_v19, %v1082_v41 }
 0x164   :  { %v2585_v48 = vpop.f32.mrb[52].mxu0  ;;  %v2587_v2 = vpop.f32.mrb[52].mxu1 }
 0x165   :  { %3909 = vst [vmem:[#allocation15_spill] sm:$0xff] %v2585_v48  ;;  %3910 = vst [vmem:[#allocation16_spill] sm:$0xff] %v2587_v2  ;;  %v888_v5 = vsel %vm836_vm1, %v2585_v48, 0.0  ;;  %v996_v56 = vmul.f32 %v2585_v48, %v2585_v48  ;;  %v687_v26 = vpop.f32.mrb[53].mxu0  ;;  %v815_v9 = vpop.f32.mrb[53].mxu1 }
 0x166   :  { %v889_v39 = vadd.f32 %v888_v5, %v887_v49  ;;  %v2593_v32 = vpop.f32.mrb[54].mxu0  ;;  %v2595_v57 = vpop.f32.mrb[54].mxu1 }
 0x167   :  { %3911 = vst [vmem:[#allocation17_spill] sm:$0xff] %v2593_v32  ;;  %3912 = vst [vmem:[#allocation18_spill] sm:$0xff] %v2595_v57  ;;  %v1085_v23 = vsel %vm836_vm1, %v996_v56, 0.0  ;;  %v890_v20 = vsel %vm836_vm1, %v2593_v32, 0.0  ;;  %v997_v24 = vmul.f32 %v2593_v32, %v2593_v32  ;;  %v690_v25 = vpop.f32.mrb[55].mxu0  ;;  %v818_v40 = vpop.f32.mrb[55].mxu1 }
 0x168   :  { %v1086_v41 = vadd.f32 %v1085_v23, %v1084_v59  ;;  %v891_v19 = vadd.f32 %v890_v20, %v889_v39 }
 0x169   :  { %v1087_v26 = vsel %vm836_vm1, %v997_v24, 0.0 }
 0x16a   :  { %v1088_v9 = vadd.f32 %v1087_v26, %v1086_v41 }
 0x16c   :  { %v2603_v49 = vpop.f32.mrb[56].mxu0  ;;  %v2605_v5 = vpop.f32.mrb[56].mxu1 }
 0x16d   :  { %3913 = vst [vmem:[#allocation19_spill] sm:$0xff] %v2603_v49  ;;  %3914 = vst [vmem:[#allocation20_spill] sm:$0xff] %v2605_v5  ;;  %v892_v56 = vsel %vm836_vm1, %v2603_v49, 0.0  ;;  %v998_v48 = vmul.f32 %v2603_v49, %v2603_v49  ;;  %v695_v50 = vpop.f32.mrb[57].mxu0  ;;  %v823_v37 = vpop.f32.mrb[57].mxu1 }
 0x16e   :  { %v893_v32 = vadd.f32 %v892_v56, %v891_v19  ;;  %v2611_v25 = vpop.f32.mrb[58].mxu0  ;;  %v2613_v59 = vpop.f32.mrb[58].mxu1 }
 0x16f   :  { %3915 = vst [vmem:[#allocation21_spill] sm:$0xff] %v2611_v25  ;;  %3916 = vst [vmem:[#allocation22_spill] sm:$0xff] %v2613_v59  ;;  %v1089_v39 = vsel %vm836_vm1, %v998_v48, 0.0  ;;  %v894_v23 = vsel %vm836_vm1, %v2611_v25, 0.0  ;;  %v999_v20 = vmul.f32 %v2611_v25, %v2611_v25  ;;  %v698_v24 = vpop.f32.mrb[59].mxu0  ;;  %v826_v40 = vpop.f32.mrb[59].mxu1 }
 0x170   :  { %v1090_v41 = vadd.f32 %v1089_v39, %v1088_v9  ;;  %v895_v26 = vadd.f32 %v894_v23, %v893_v32  ;;  %v1002_v32 = vmul.f32 %v2353_v12, %v2353_v12 }
 0x171   :  { %v1091_v50 = vsel %vm836_vm1, %v999_v20, 0.0 }
 0x172   :  { %v1092_v37 = vadd.f32 %v1091_v50, %v1090_v41  ;;  %v1003_v50 = vmul.f32 %v2359_v17, %v2359_v17  ;;  %v1097_v42 = vsel %vm836_vm1, %v1002_v32, 0.0 }
 0x174   :  { %v2621_v19 = vpop.f32.mrb[60].mxu0  ;;  %v2623_v56 = vpop.f32.mrb[60].mxu1 }
 0x175   :  { %3917 = vst [vmem:[#allocation23_spill] sm:$0xff] %v2621_v19  ;;  %3918 = vst [vmem:[#allocation24_spill] sm:$0xff] %v2623_v56  ;;  %v896_v48 = vsel %vm836_vm1, %v2621_v19, 0.0  ;;  %v1000_v49 = vmul.f32 %v2621_v19, %v2621_v19  ;;  %v703_v10 = vpop.f32.mrb[61].mxu0  ;;  %v831_v61 = vpop.f32.mrb[61].mxu1 }
 0x176   :  { %v897_v25 = vadd.f32 %v896_v48, %v895_v26  ;;  %v2629_v24 = vpop.f32.mrb[62].mxu0  ;;  %v2631_v9 = vpop.f32.mrb[62].mxu1  ;;  %v900_v26 = vsel %vm836_vm1, %v2353_v12, 0.0 }
 0x177   :  { %3919 = vst [vmem:[#allocation25_spill] sm:$0xff] %v2631_v9  ;;  %v1093_v39 = vsel %vm836_vm1, %v1000_v49, 0.0  ;;  %v898_v23 = vsel %vm836_vm1, %v2629_v24, 0.0  ;;  %v1001_v20 = vmul.f32 %v2629_v24, %v2629_v24  ;;  %v706_v40 = vpop.f32.mrb[63].mxu0  ;;  %v834_v41 = vpop.f32.mrb[63].mxu1 }
 0x178   :  { %v1094_v10 = vadd.f32 %v1093_v39, %v1092_v37  ;;  %v899_v61 = vadd.f32 %v898_v23, %v897_v25  ;;  %v1004_v40 = vmul.f32 %v2371_v28, %v2371_v28  ;;  %v1099_v39 = vsel %vm836_vm1, %v1003_v50, 0.0 }
 0x179   :  { %v1095_v48 = vsel %vm836_vm1, %v1001_v20, 0.0  ;;  %v904_v23 = vsel %vm836_vm1, %v2371_v28, 0.0  ;;  %v1005_v20 = vmul.f32 %v2379_v35, %v2379_v35  ;;  %v908_v50 = vsel %vm836_vm1, %v2389_v46, 0.0 }
 0x17a   :  { %v901_v19 = vadd.f32 %v900_v26, %v899_v61  ;;  %v1096_v49 = vadd.f32 %v1095_v48, %v1094_v10  ;;  %v1101_v32 = vsel %vm836_vm1, %v1004_v40, 0.0  ;;  %v906_v61 = vsel %vm836_vm1, %v2379_v35, 0.0 }
 0x17b   :  { %v1006_v26 = vmul.f32 %v2389_v46, %v2389_v46  ;;  %v1007_v48 = vmul.f32 %v2397_v53, %v2397_v53 }
 0x17c   :  { %v903_v37 = vadd.f32 %v902_v33, %v901_v19  ;;  %v1098_v25 = vadd.f32 %v1097_v42, %v1096_v49  ;;  %v1103_v19 = vsel %vm836_vm1, %v1005_v20, 0.0 }
 0x17d   :  { %v1105_v40 = vsel %vm836_vm1, %v1006_v26, 0.0  ;;  %v1107_v20 = vsel %vm836_vm1, %v1007_v48, 0.0 }
 0x17e   :  { %v905_v41 = vadd.f32 %v904_v23, %v903_v37  ;;  %v1100_v10 = vadd.f32 %v1099_v39, %v1098_v25  ;;  %v910_v25 = vsel %vm836_vm1, %v2397_v53, 0.0  ;;  %v1008_v39 = vmul.f32 %v2407_v0, %v2407_v0 }
 0x180   :  { %v907_v33 = vadd.f32 %v906_v61, %v905_v41  ;;  %v1102_v42 = vadd.f32 %v1101_v32, %v1100_v10  ;;  %v912_v10 = vsel %vm836_vm1, %v2407_v0, 0.0  ;;  %v1009_v32 = vmul.f32 %v2415_v7, %v2415_v7 }
 0x181   :  { %v1109_v26 = vsel %vm836_vm1, %v1008_v39, 0.0 }
 0x182   :  { %v909_v49 = vadd.f32 %v908_v50, %v907_v33  ;;  %v1104_v37 = vadd.f32 %v1103_v19, %v1102_v42  ;;  %v914_v42 = vsel %vm836_vm1, %v2415_v7, 0.0  ;;  %v1010_v19 = vmul.f32 %v2425_v22, %v2425_v22 }
 0x183   :  { %v1111_v48 = vsel %vm836_vm1, %v1009_v32, 0.0 }
 0x184   :  { %v911_v23 = vadd.f32 %v910_v25, %v909_v49  ;;  %v1106_v41 = vadd.f32 %v1105_v40, %v1104_v37  ;;  %v916_v37 = vsel %vm836_vm1, %v2425_v22, 0.0  ;;  %v1011_v40 = vmul.f32 %v2433_v31, %v2433_v31 }
 0x185   :  { %v1113_v39 = vsel %vm836_vm1, %v1010_v19, 0.0 }
 0x186   :  { %v913_v61 = vadd.f32 %v912_v10, %v911_v23  ;;  %v1108_v33 = vadd.f32 %v1107_v20, %v1106_v41  ;;  %v918_v41 = vsel %vm836_vm1, %v2433_v31, 0.0  ;;  %v1012_v20 = vmul.f32 %v2443_v44, %v2443_v44 }
 0x187   :  { %v1115_v32 = vsel %vm836_vm1, %v1011_v40, 0.0 }
 0x188   :  { %v915_v50 = vadd.f32 %v914_v42, %v913_v61  ;;  %v1110_v49 = vadd.f32 %v1109_v26, %v1108_v33  ;;  %v920_v33 = vsel %vm836_vm1, %v2443_v44, 0.0  ;;  %v1013_v26 = vmul.f32 %v2451_v55, %v2451_v55 }
 0x189   :  { %v1117_v19 = vsel %vm836_vm1, %v1012_v20, 0.0 }
 0x18a   :  { %v1112_v25 = vadd.f32 %v1111_v48, %v1110_v49  ;;  %v917_v23 = vadd.f32 %v916_v37, %v915_v50  ;;  %v922_v49 = vsel %vm836_vm1, %v2451_v55, 0.0  ;;  %v1014_v48 = vmul.f32 %v2461_v4, %v2461_v4 }
 0x18b   :  { %v1119_v40 = vsel %vm836_vm1, %v1013_v26, 0.0 }
 0x18c   :  { %v919_v10 = vadd.f32 %v918_v41, %v917_v23  ;;  %v1114_v61 = vadd.f32 %v1113_v39, %v1112_v25  ;;  %v924_v23 = vsel %vm836_vm1, %v2461_v4, 0.0  ;;  %v1015_v39 = vmul.f32 %v2469_v15, %v2469_v15 }
 0x18d   :  { %v1121_v20 = vsel %vm836_vm1, %v1014_v48, 0.0 }
 0x18e   :  { %v921_v42 = vadd.f32 %v920_v33, %v919_v10  ;;  %v1116_v50 = vadd.f32 %v1115_v32, %v1114_v61  ;;  %v926_v61 = vsel %vm836_vm1, %v2469_v15, 0.0  ;;  %v1016_v32 = vmul.f32 %v2479_v36, %v2479_v36 }
 0x18f   :  { %v1123_v26 = vsel %vm836_vm1, %v1015_v39, 0.0 }
 0x190   :  { %v923_v37 = vadd.f32 %v922_v49, %v921_v42  ;;  %v1118_v25 = vadd.f32 %v1117_v19, %v1116_v50  ;;  %v928_v50 = vsel %vm836_vm1, %v2479_v36, 0.0  ;;  %v1017_v19 = vmul.f32 %v2487_v47, %v2487_v47 }
 0x191   :  { %v1125_v48 = vsel %vm836_vm1, %v1016_v32, 0.0 }
 0x192   :  { %v925_v41 = vadd.f32 %v924_v23, %v923_v37  ;;  %v1120_v10 = vadd.f32 %v1119_v40, %v1118_v25  ;;  %v930_v25 = vsel %vm836_vm1, %v2487_v47, 0.0  ;;  %v1018_v40 = vmul.f32 %v2497_v62, %v2497_v62 }
 0x193   :  { %v1127_v39 = vsel %vm836_vm1, %v1017_v19, 0.0 }
 0x194   :  { %v927_v33 = vadd.f32 %v926_v61, %v925_v41  ;;  %v1122_v42 = vadd.f32 %v1121_v20, %v1120_v10  ;;  %v932_v10 = vsel %vm836_vm1, %v2497_v62, 0.0  ;;  %v1019_v20 = vmul.f32 %v2505_v13, %v2505_v13 }
 0x195   :  { %v1129_v32 = vsel %vm836_vm1, %v1018_v40, 0.0 }
 0x196   :  { %v929_v49 = vadd.f32 %v928_v50, %v927_v33  ;;  %v1124_v37 = vadd.f32 %v1123_v26, %v1122_v42  ;;  %v934_v42 = vsel %vm836_vm1, %v2505_v13, 0.0  ;;  %v1020_v26 = vmul.f32 %v2515_v38, %v2515_v38 }
 0x197   :  { %v1131_v19 = vsel %vm836_vm1, %v1019_v20, 0.0 }
 0x198   :  { %v931_v23 = vadd.f32 %v930_v25, %v929_v49  ;;  %v1126_v41 = vadd.f32 %v1125_v48, %v1124_v37  ;;  %v936_v37 = vsel %vm836_vm1, %v2515_v38, 0.0  ;;  %v1021_v48 = vmul.f32 %v2523_v51, %v2523_v51 }
 0x199   :  { %v1133_v40 = vsel %vm836_vm1, %v1020_v26, 0.0 }
 0x19a   :  { %v933_v61 = vadd.f32 %v932_v10, %v931_v23  ;;  %v1128_v33 = vadd.f32 %v1127_v39, %v1126_v41  ;;  %v938_v41 = vsel %vm836_vm1, %v2523_v51, 0.0  ;;  %v1022_v39 = vmul.f32 %v2533_v18, %v2533_v18 }
 0x19b   :  { %v1135_v20 = vsel %vm836_vm1, %v1021_v48, 0.0 }
 0x19c   :  { %v1130_v50 = vadd.f32 %v1129_v32, %v1128_v33  ;;  %v935_v49 = vadd.f32 %v934_v42, %v933_v61  ;;  %v940_v33 = vsel %vm836_vm1, %v2533_v18, 0.0  ;;  %v1023_v32 = vmul.f32 %v2541_v29, %v2541_v29 }
 0x19d   :  { %v1137_v26 = vsel %vm836_vm1, %v1022_v39, 0.0 }
 0x19e   :  { %v1132_v25 = vadd.f32 %v1131_v19, %v1130_v50  ;;  %v937_v23 = vadd.f32 %v936_v37, %v935_v49  ;;  %v942_v49 = vsel %vm836_vm1, %v2541_v29, 0.0  ;;  %v1024_v19 = vmul.f32 %v2551_v60, %v2551_v60 }
 0x19f   :  { %v1139_v48 = vsel %vm836_vm1, %v1023_v32, 0.0 }
 0x1a0   :  { %v1134_v10 = vadd.f32 %v1133_v40, %v1132_v25  ;;  %v939_v61 = vadd.f32 %v938_v41, %v937_v23  ;;  %v944_v23 = vsel %vm836_vm1, %v2551_v60, 0.0  ;;  %v1025_v40 = vmul.f32 %v2559_v8, %v2559_v8 }
 0x1a1   :  { %v1141_v39 = vsel %vm836_vm1, %v1024_v19, 0.0 }
 0x1a2   :  { %v1136_v42 = vadd.f32 %v1135_v20, %v1134_v10  ;;  %v941_v50 = vadd.f32 %v940_v33, %v939_v61  ;;  %v946_v61 = vsel %vm836_vm1, %v2559_v8, 0.0  ;;  %v1026_v20 = vmul.f32 %v2569_v1, %v2569_v1 }
 0x1a3   :  { %v1143_v32 = vsel %vm836_vm1, %v1025_v40, 0.0 }
 0x1a4   :  { %v1138_v37 = vadd.f32 %v1137_v26, %v1136_v42  ;;  %v943_v25 = vadd.f32 %v942_v49, %v941_v50  ;;  %v948_v50 = vsel %vm836_vm1, %v2569_v1, 0.0  ;;  %v1027_v26 = vmul.f32 %v2577_v58, %v2577_v58 }
 0x1a5   :  { %v1145_v19 = vsel %vm836_vm1, %v1026_v20, 0.0 }
 0x1a6   :  { %v1140_v41 = vadd.f32 %v1139_v48, %v1138_v37  ;;  %v945_v10 = vadd.f32 %v944_v23, %v943_v25  ;;  %v950_v25 = vsel %vm836_vm1, %v2577_v58, 0.0  ;;  %v1028_v48 = vmul.f32 %v2587_v2, %v2587_v2 }
 0x1a7   :  { %v1147_v40 = vsel %vm836_vm1, %v1027_v26, 0.0 }
 0x1a8   :  { %v1142_v33 = vadd.f32 %v1141_v39, %v1140_v41  ;;  %v947_v42 = vadd.f32 %v946_v61, %v945_v10  ;;  %v952_v10 = vsel %vm836_vm1, %v2587_v2, 0.0  ;;  %v1029_v39 = vmul.f32 %v2595_v57, %v2595_v57 }
 0x1a9   :  { %v1149_v20 = vsel %vm836_vm1, %v1028_v48, 0.0 }
 0x1aa   :  { %v1144_v49 = vadd.f32 %v1143_v32, %v1142_v33  ;;  %v949_v37 = vadd.f32 %v948_v50, %v947_v42  ;;  %v954_v42 = vsel %vm836_vm1, %v2595_v57, 0.0  ;;  %v1030_v32 = vmul.f32 %v2605_v5, %v2605_v5 }
 0x1ab   :  { %v1151_v26 = vsel %vm836_vm1, %v1029_v39, 0.0 }
 0x1ac   :  { %v1146_v23 = vadd.f32 %v1145_v19, %v1144_v49  ;;  %v951_v41 = vadd.f32 %v950_v25, %v949_v37  ;;  %v956_v37 = vsel %vm836_vm1, %v2605_v5, 0.0  ;;  %v1031_v19 = vmul.f32 %v2613_v59, %v2613_v59 }
 0x1ad   :  { %v1032_v25 = vmul.f32 %v2623_v56, %v2623_v56 }
 0x1ae   :  { %v1148_v61 = vadd.f32 %v1147_v40, %v1146_v23  ;;  %v953_v33 = vadd.f32 %v952_v10, %v951_v41  ;;  %v1153_v41 = vsel %vm836_vm1, %v1030_v32, 0.0  ;;  %v958_v40 = vsel %vm836_vm1, %v2613_v59, 0.0 }
 0x1af   :  { %v960_v10 = vsel %vm836_vm1, %v2623_v56, 0.0  ;;  %v962_v32 = vsel %vm836_vm1, %v2631_v9, 0.0 }
 0x1b0   :  { %v1150_v50 = vadd.f32 %v1149_v20, %v1148_v61  ;;  %v955_v49 = vadd.f32 %v954_v42, %v953_v33  ;;  %v1155_v33 = vsel %vm836_vm1, %v1031_v19, 0.0  ;;  %v1157_v20 = vsel %vm836_vm1, %v1032_v25, 0.0 }
 0x1b1   :  { %v1033_v42 = vmul.f32 %v2631_v9, %v2631_v9 }
 0x1b2   :  { %v1152_v48 = vadd.f32 %v1151_v26, %v1150_v50  ;;  %v957_v23 = vadd.f32 %v956_v37, %v955_v49 }
 0x1b3   :  { %v1159_v37 = vsel %vm836_vm1, %v1033_v42, 0.0  ;;  %v1180_v42 = vlaneseq }
 0x1b4   :  { %v1154_v39 = vadd.f32 %v1153_v41, %v1152_v48  ;;  %v959_v61 = vadd.f32 %v958_v40, %v957_v23 }
 0x1b6   :  { %v1156_v5 = vadd.f32 %v1155_v33, %v1154_v39  ;;  %v961_v50 = vadd.f32 %v960_v10, %v959_v61 }
 0x1b8   :  { %v1158_v49 = vadd.f32 %v1157_v20, %v1156_v5  ;;  %v963_v26 = vadd.f32 %v962_v32, %v961_v50  ;;  %v2799_v32 = vshrl.u32 %v1180_v42, 7  ;;  %v3927_v42 = vld [vmem:[#allocation9_spill] sm:$0xff] }
 0x1ba   :  { %v964_v59 = vrot.slane %v963_v26, 4  ;;  %v1160_v56 = vadd.f32 %v1159_v37, %v1158_v49 }
 0x1bc   :  { %v965_v48 = vadd.f32 %v964_v59, %v963_v26  ;;  %v1161_v23 = vrot.slane %v1160_v56, 4  ;;  %v1172_v59 = vld [vmem:[%s3851_s2] sm:$0x1]  ;;  %v3935_v26 = vld [vmem:[#allocation17_spill] sm:$0xff] }
 0x1be   :  { %v966_v41 = vrot.slane %v965_v48, 2  ;;  %v1162_v19 = vadd.f32 %v1161_v23, %v1160_v56  ;;  %v3878_v56 = vsub.s32 0, %v2799_v32 }
 0x1c0   :  { %v967_v40 = vadd.f32 %v966_v41, %v965_v48  ;;  %v1163_v25 = vrot.slane %v1162_v19, 2 }
 0x1c2   :  { %v968_v57 = vrot.slane %v967_v40, 1  ;;  %v1164_v2 = vadd.f32 %v1163_v25, %v1162_v19  ;;  %v3921_v25 = vld [vmem:[#allocation3_spill] sm:$0xff] }
 0x1c4   :  { %v969_v58 = vadd.f32 %v968_v57, %v967_v40  ;;  %v1165_v39 = vrot.slane %v1164_v2, 1  ;;  %v3920_v40 = vld [vmem:[#allocation2_spill] sm:$0xff] }
 0x1c6   :  { %v1166_v10 = vadd.f32 %v1165_v39, %v1164_v2  ;;  %v1167_v61 = vmul.f32 0.001953125, %v969_v58  ;;  %v2808_v58 = vld [vmem:[%s3852_s3] sm:$0x1]  ;;  %v3922_v39 = vld [vmem:[#allocation4_spill] sm:$0xff] }
 0x1c8   :  { %v1168_v33 = vmul.f32 0.001953125, %v1166_v10  ;;  %v1169_v9 = vmul.f32 %v1167_v61, %v1167_v61  ;;  %v3923_v10 = vld [vmem:[#allocation5_spill] sm:$0xff] }
 0x1ca   :  { %v1170_v5 = vsub.f32 %v1168_v33, %v1169_v9  ;;  %v3925_v33 = vld [vmem:[#allocation7_spill] sm:$0xff] }
 0x1cc   :  { %v1171_v20 = vmax.f32 %v1170_v5, 0.0 }
 0x1ce   :  { %v1173_v50 = vadd.f32 1e-05, %v1171_v20  ;;  %v3926_v20 = vld [vmem:[#allocation8_spill] sm:$0xff] }
 0x1d0   :  { %2069 = vrsqrt.f32 %v1173_v50 }
 0x1da   :  { %v2070_v49 = vpop.eup %2069 }
 0x1db   :  { %v1175_v57 = vmul.f32 %v2070_v49, %v1172_v59  ;;  %v3928_v49 = vld [vmem:[#allocation10_spill] sm:$0xff] }
 0x1dd   :  { %v2810_v2 = vmul.f32 %v1175_v57, %v1167_v61  ;;  %v2814_v9 = vrot.slane %v1175_v57, %v3878_v56  ;;  %v3924_v61 = vld [vmem:[#allocation6_spill] sm:$0xff]  ;;  %v3936_v56 = vld [vmem:[#allocation19_spill] sm:$0xff] }
 0x1df   :  { %v2820_v37 = vmul.f32 %v2814_v9, %v2351_v11  ;;  %v2824_v48 = vmul.f32 %v2814_v9, %v2357_v16  ;;  %v2828_v23 = vmul.f32 %v2814_v9, %v2369_v27  ;;  %v2832_v41 = vmul.f32 %v2814_v9, %v2377_v34 }
 0x1e0   :  { %v2836_v19 = vmul.f32 %v2814_v9, %v2387_v45  ;;  %v2840_v11 = vmul.f32 %v2814_v9, %v2395_v52  ;;  %v2844_v16 = vmul.f32 %v2814_v9, %v2405_v63  ;;  %v2848_v27 = vmul.f32 %v2814_v9, %v2413_v6 }
 0x1e1   :  { %v2852_v34 = vmul.f32 %v2814_v9, %v2423_v21  ;;  %v2856_v45 = vmul.f32 %v2814_v9, %v2431_v30  ;;  %v2860_v52 = vmul.f32 %v2814_v9, %v2441_v43  ;;  %v2864_v63 = vmul.f32 %v2814_v9, %v2449_v54 }
 0x1e2   :  { %v2868_v6 = vmul.f32 %v2814_v9, %v2459_v3  ;;  %v2872_v21 = vmul.f32 %v2814_v9, %v2467_v14  ;;  %v2876_v30 = vmul.f32 %v2814_v9, %v3920_v40  ;;  %v2880_v43 = vmul.f32 %v2814_v9, %v3921_v25  ;;  %v3929_v40 = vld [vmem:[#allocation11_spill] sm:$0xff] }
 0x1e3   :  { %v2884_v54 = vmul.f32 %v2814_v9, %v3922_v39  ;;  %v2888_v3 = vmul.f32 %v2814_v9, %v3923_v10  ;;  %v2892_v14 = vmul.f32 %v2814_v9, %v3924_v61  ;;  %v2896_v5 = vmul.f32 %v2814_v9, %v3925_v33  ;;  %v3931_v39 = vld [vmem:[#allocation12_spill] sm:$0xff]  ;;  %v3933_v61 = vld [vmem:[#allocation13_spill] sm:$0xff] }
 0x1e4   :  { %v2900_v50 = vmul.f32 %v2814_v9, %v3926_v20  ;;  %v2904_v59 = vmul.f32 %v2814_v9, %v3927_v42  ;;  %v2908_v57 = vmul.f32 %v2814_v9, %v3928_v49  ;;  %v2912_v25 = vmul.f32 %v2814_v9, %v3929_v40  ;;  %v3934_v20 = vld [vmem:[#allocation15_spill] sm:$0xff] }
 0x1e5   :  { %v2916_v10 = vmul.f32 %v2814_v9, %v3931_v39  ;;  %v2920_v33 = vmul.f32 %v2814_v9, %v3933_v61  ;;  %v2924_v42 = vmul.f32 %v2814_v9, %v3934_v20  ;;  %v2928_v49 = vmul.f32 %v2814_v9, %v3935_v26 }
 0x1e6   :  { %3930 = vst [vmem:[#allocation2_spill] sm:$0xff] %v2912_v25  ;;  %v2932_v40 = vmul.f32 %v2814_v9, %v3936_v56  ;;  %v3937_v25 = vld [vmem:[#allocation21_spill] sm:$0xff]  ;;  %v2944_v20 = vmul.f32 %v2814_v9, %v2629_v24  ;;  %v2948_v26 = vmul.f32 %v2814_v9, %v2353_v12  ;;  %v2952_v56 = vmul.f32 %v2814_v9, %v2359_v17 }
 0x1e7   :  { %3932 = vst [vmem:[#allocation3_spill] sm:$0xff] %v2916_v10  ;;  %v2936_v39 = vmul.f32 %v2814_v9, %v3937_v25  ;;  %v3938_v10 = vld [vmem:[#allocation23_spill] sm:$0xff]  ;;  %v2956_v25 = vmul.f32 %v2814_v9, %v2371_v28  ;;  %v2964_v24 = vmul.f32 %v2814_v9, %v2389_v46  ;;  %v2968_v12 = vmul.f32 %v2814_v9, %v2397_v53 }
 0x1e8   :  { %v2940_v61 = vmul.f32 %v2814_v9, %v3938_v10  ;;  %v2960_v10 = vmul.f32 %v2814_v9, %v2379_v35  ;;  %v2972_v17 = vmul.f32 %v2814_v9, %v2407_v0  ;;  %v2976_v28 = vmul.f32 %v2814_v9, %v2415_v7 }
 0x1e9   :  { %v2980_v35 = vmul.f32 %v2814_v9, %v2425_v22  ;;  %v2984_v46 = vmul.f32 %v2814_v9, %v2433_v31  ;;  %v2988_v53 = vmul.f32 %v2814_v9, %v2443_v44  ;;  %v2992_v0 = vmul.f32 %v2814_v9, %v2451_v55 }
 0x1ea   :  { %v2996_v7 = vmul.f32 %v2814_v9, %v2461_v4  ;;  %v3000_v22 = vmul.f32 %v2814_v9, %v2469_v15  ;;  %v3004_v31 = vmul.f32 %v2814_v9, %v2479_v36  ;;  %v3008_v44 = vmul.f32 %v2814_v9, %v2487_v47 }
 0x1eb   :  { %v3012_v55 = vmul.f32 %v2814_v9, %v2497_v62  ;;  %v3016_v4 = vmul.f32 %v2814_v9, %v2505_v13  ;;  %v3020_v15 = vmul.f32 %v2814_v9, %v2515_v38  ;;  %v3024_v36 = vmul.f32 %v2814_v9, %v2523_v51 }
 0x1ec   :  { %v3028_v47 = vmul.f32 %v2814_v9, %v2533_v18  ;;  %v3032_v62 = vmul.f32 %v2814_v9, %v2541_v29  ;;  %v3036_v13 = vmul.f32 %v2814_v9, %v2551_v60  ;;  %v3040_v38 = vmul.f32 %v2814_v9, %v2559_v8 }
 0x1ed   :  { %3939 = vst [vmem:[#allocation4_spill] sm:$0xff] %v3024_v36  ;;  %v3044_v51 = vmul.f32 %v2814_v9, %v2569_v1  ;;  %v3945_v36 = vld [vmem:[#allocation14_spill] sm:$0xff] }
 0x1ee   :  { %3940 = vst [vmem:[#allocation5_spill] sm:$0xff] %v3028_v47  ;;  %3941 = vst [vmem:[#allocation6_spill] sm:$0xff] %v3032_v62  ;;  %v3048_v18 = vmul.f32 %v2814_v9, %v3945_v36  ;;  %v3947_v47 = vld [vmem:[#allocation16_spill] sm:$0xff]  ;;  %v3949_v62 = vld [vmem:[#allocation18_spill] sm:$0xff] }
 0x1ef   :  { %3942 = vst [vmem:[#allocation7_spill] sm:$0xff] %v3036_v13  ;;  %3943 = vst [vmem:[#allocation8_spill] sm:$0xff] %v3040_v38  ;;  %v3052_v29 = vmul.f32 %v2814_v9, %v3947_v47  ;;  %v3056_v60 = vmul.f32 %v2814_v9, %v3949_v62  ;;  %v3951_v13 = vld [vmem:[#allocation20_spill] sm:$0xff]  ;;  %v3952_v38 = vld [vmem:[#allocation22_spill] sm:$0xff]  ;;  %v3956_v62 = vsub.f32 %v2808_v58, %v2810_v2 }
 0x1f0   :  { %3944 = vst [vmem:[#allocation9_spill] sm:$0xff] %v3044_v51  ;;  %3946 = vst [vmem:[#allocation10_spill] sm:$0xff] %v3048_v18  ;;  %v3060_v8 = vmul.f32 %v2814_v9, %v3951_v13  ;;  %v3064_v1 = vmul.f32 %v2814_v9, %v3952_v38  ;;  %v3953_v51 = vld [vmem:[#allocation24_spill] sm:$0xff]  ;;  %v3954_v18 = vld [vmem:[#allocation25_spill] sm:$0xff] }
 0x1f1   :  { %3948 = vst [vmem:[#allocation11_spill] sm:$0xff] %v3052_v29  ;;  %3950 = vst [vmem:[#allocation12_spill] sm:$0xff] %v3056_v60  ;;  %v3068_v36 = vmul.f32 %v2814_v9, %v3953_v51  ;;  %v3072_v47 = vmul.f32 %v2814_v9, %v3954_v18  ;;  %v3955_v29 = vsub.s32 0, %v2799_v32 }
 0x1f3   :  { %v3079_v60 = vrot.slane %v3956_v62, %v3955_v29 }
 0x1f4   :  { %v3968_v62 = vld [vmem:[#allocation4_spill] sm:$0xff] }
 0x1f5   :  { %v3083_v13 = vadd.f32 %v3079_v60, %v2820_v37  ;;  %v3087_v38 = vadd.f32 %v3079_v60, %v2824_v48  ;;  %v3091_v51 = vadd.f32 %v3079_v60, %v2828_v23  ;;  %v3095_v32 = vadd.f32 %v3079_v60, %v2832_v41 }
 0x1f6   :  { %v3099_v58 = vadd.f32 %v3079_v60, %v2836_v19  ;;  %v3103_v2 = vadd.f32 %v3079_v60, %v2840_v11  ;;  %v3107_v9 = vadd.f32 %v3079_v60, %v2844_v16  ;;  %v3111_v37 = vadd.f32 %v3079_v60, %v2848_v27 }
 0x1f7   :  { %v3115_v48 = vadd.f32 %v3079_v60, %v2852_v34  ;;  %v3119_v23 = vadd.f32 %v3079_v60, %v2856_v45  ;;  %v3123_v41 = vadd.f32 %v3079_v60, %v2860_v52  ;;  %v3127_v19 = vadd.f32 %v3079_v60, %v2864_v63 }
 0x1f8   :  { %v3131_v11 = vadd.f32 %v3079_v60, %v2868_v6  ;;  %v3135_v16 = vadd.f32 %v3079_v60, %v2872_v21  ;;  %v3139_v27 = vadd.f32 %v3079_v60, %v2876_v30  ;;  %v3143_v34 = vadd.f32 %v3079_v60, %v2880_v43 }
 0x1f9   :  { %v3147_v45 = vadd.f32 %v3079_v60, %v2884_v54  ;;  %v3151_v52 = vadd.f32 %v3079_v60, %v2888_v3  ;;  %v3155_v63 = vadd.f32 %v3079_v60, %v2892_v14  ;;  %v3159_v6 = vadd.f32 %v3079_v60, %v2896_v5  ;;  %v3957_v54 = vld [vmem:[#allocation2_spill] sm:$0xff]  ;;  %v3958_v14 = vld [vmem:[#allocation3_spill] sm:$0xff] }
 0x1fa   :  { %v3163_v21 = vadd.f32 %v3079_v60, %v2900_v50  ;;  %v3167_v30 = vadd.f32 %v3079_v60, %v2904_v59  ;;  %v3171_v43 = vadd.f32 %v3079_v60, %v2908_v57  ;;  %v3175_v3 = vadd.f32 %v3079_v60, %v3957_v54  ;;  %v3970_v54 = vld [vmem:[#allocation5_spill] sm:$0xff] }
 0x1fb   :  { %v3179_v5 = vadd.f32 %v3079_v60, %v3958_v14  ;;  %v3183_v50 = vadd.f32 %v3079_v60, %v2920_v33  ;;  %v3187_v59 = vadd.f32 %v3079_v60, %v2924_v42  ;;  %v3191_v57 = vadd.f32 %v3079_v60, %v2928_v49  ;;  %v3972_v14 = vld [vmem:[#allocation6_spill] sm:$0xff] }
 0x1fc   :  { %v3195_v18 = vadd.f32 %v3079_v60, %v2932_v40  ;;  %v3199_v29 = vadd.f32 %v3079_v60, %v2936_v39  ;;  %v3203_v33 = vadd.f32 %v3079_v60, %v2940_v61  ;;  %v3207_v42 = vadd.f32 %v3079_v60, %v2944_v20 }
 0x1fd   :  { %v3211_v49 = vadd.f32 %v3079_v60, %v2948_v26  ;;  %v3215_v40 = vadd.f32 %v3079_v60, %v2952_v56  ;;  %v3219_v39 = vadd.f32 %v3079_v60, %v2956_v25  ;;  %v3223_v61 = vadd.f32 %v3079_v60, %v2960_v10 }
 0x1fe   :  { %v3227_v20 = vadd.f32 %v3079_v60, %v2964_v24  ;;  %v3231_v26 = vadd.f32 %v3079_v60, %v2968_v12  ;;  %v3235_v56 = vadd.f32 %v3079_v60, %v2972_v17  ;;  %v3239_v25 = vadd.f32 %v3079_v60, %v2976_v28 }
 0x1ff   :  { %v3243_v10 = vadd.f32 %v3079_v60, %v2980_v35  ;;  %v3247_v24 = vadd.f32 %v3079_v60, %v2984_v46  ;;  %v3251_v12 = vadd.f32 %v3079_v60, %v2988_v53  ;;  %v3255_v17 = vadd.f32 %v3079_v60, %v2992_v0 }
 0x200   :  { %3959 = vst [vmem:[#allocation13_spill] sm:$0xff] %v3235_v56  ;;  %3960 = vst [vmem:[#allocation15_spill] sm:$0xff] %v3239_v25  ;;  %v3259_v28 = vadd.f32 %v3079_v60, %v2996_v7  ;;  %v3263_v35 = vadd.f32 %v3079_v60, %v3000_v22  ;;  %v3267_v46 = vadd.f32 %v3079_v60, %v3004_v31 }
 0x201   :  { %3961 = vst [vmem:[#allocation17_spill] sm:$0xff] %v3243_v10  ;;  %3962 = vst [vmem:[#allocation19_spill] sm:$0xff] %v3247_v24  ;;  %v3271_v53 = vadd.f32 %v3079_v60, %v3008_v44  ;;  %v3275_v0 = vadd.f32 %v3079_v60, %v3012_v55  ;;  %v3279_v7 = vadd.f32 %v3079_v60, %v3016_v4 }
 0x202   :  { %3963 = vst [vmem:[#allocation21_spill] sm:$0xff] %v3251_v12  ;;  %v3283_v22 = vadd.f32 %v3079_v60, %v3020_v15  ;;  %v3287_v31 = vadd.f32 %v3079_v60, %v3968_v62  ;;  %v3291_v44 = vadd.f32 %v3079_v60, %v3970_v54  ;;  %v3295_v55 = vadd.f32 %v3079_v60, %v3972_v14 }
 0x203   :  { %3964 = vst [vmem:[#allocation23_spill] sm:$0xff] %v3271_v53  ;;  %3965 = vst [vmem:[#allocation14_spill] sm:$0xff] %v3275_v0  ;;  %v3974_v0 = vld [vmem:[#allocation7_spill] sm:$0xff] }
 0x204   :  { %3966 = vst [vmem:[#allocation16_spill] sm:$0xff] %v3279_v7  ;;  %3967 = vst [vmem:[#allocation18_spill] sm:$0xff] %v3283_v22  ;;  %v3299_v4 = vadd.f32 %v3079_v60, %v3974_v0  ;;  %v3975_v7 = vld [vmem:[#allocation8_spill] sm:$0xff]  ;;  %v3976_v22 = vld [vmem:[#allocation9_spill] sm:$0xff] }
 0x205   :  { %3969 = vst [vmem:[#allocation20_spill] sm:$0xff] %v3287_v31  ;;  %3971 = vst [vmem:[#allocation22_spill] sm:$0xff] %v3291_v44  ;;  %v3303_v15 = vadd.f32 %v3079_v60, %v3975_v7  ;;  %v3307_v62 = vadd.f32 %v3079_v60, %v3976_v22  ;;  %v3977_v31 = vld [vmem:[#allocation10_spill] sm:$0xff]  ;;  %v3978_v44 = vld [vmem:[#allocation11_spill] sm:$0xff]  ;;  %v3323_v7 = vadd.f32 %v3079_v60, %v3060_v8 }
 0x206   :  { %3973 = vst [vmem:[#allocation24_spill] sm:$0xff] %v3295_v55  ;;  %v3311_v54 = vadd.f32 %v3079_v60, %v3977_v31  ;;  %v3315_v14 = vadd.f32 %v3079_v60, %v3978_v44  ;;  %v3980_v55 = vld [vmem:[#allocation12_spill] sm:$0xff]  ;;  %v3327_v22 = vadd.f32 %v3079_v60, %v3064_v1  ;;  %v3331_v31 = vadd.f32 %v3079_v60, %v3068_v36 }
 0x207   :  { %v3319_v0 = vadd.f32 %v3079_v60, %v3980_v55  ;;  %3982 = vst [vmem:[#allocation3_spill] sm:$0xff] %v3323_v7  ;;  %v3335_v44 = vadd.f32 %v3079_v60, %v3072_v47  ;;  %v3993_v56 = vmov %v3323_v7  ;;  %v3996_v7 = vmax.f32 %v3083_v13, 0.0 }
 0x208   :  { %3979 = vst [vmem:[#allocation25_spill] sm:$0xff] %v3315_v14  ;;  %3983 = vst [vmem:[#allocation4_spill] sm:$0xff] %v3327_v22  ;;  %v3994_v25 = vmov %v3327_v22  ;;  %v3995_v10 = vmov %v3331_v31  ;;  %v3997_v22 = vmax.f32 %v3087_v38, 0.0  ;;  %v3999_v47 = vmax.f32 %v3095_v32, 0.0 }
 0x209   :  { %3981 = vst [vmem:[#allocation2_spill] sm:$0xff] %v3319_v0  ;;  %3984 = vst [vmem:[#allocation5_spill] sm:$0xff] %v3331_v31  ;;  %v3992_v14 = vmov %v3319_v0  ;;  %v1878_v1 = vpack.c.bf16 %v3996_v7, %v3996_v7  ;;  %v3998_v31 = vmax.f32 %v3091_v51, 0.0  ;;  %v4000_v0 = vmax.f32 %v3099_v58, 0.0 }
 0x20a   :  { %v1879_v36 = vpack.c.bf16 %v3997_v22, %v3997_v22  ;;  %v1881_v55 = vpack.c.bf16 %v3999_v47, %v3999_v47  ;;  %v4001_v13 = vmax.f32 %v3103_v2, 0.0  ;;  %v4002_v38 = vmax.f32 %v3107_v9, 0.0 }
 0x20b   :  { %v1880_v60 = vpack.c.bf16 %v3998_v31, %v3998_v31  ;;  %v1882_v8 = vpack.c.bf16 %v4000_v0, %v4000_v0  ;;  %v4003_v51 = vmax.f32 %v3111_v37, 0.0  ;;  %v4004_v32 = vmax.f32 %v3115_v48, 0.0  ;;  %1640 = vst.msk [vmem:[%s3853_s4] sm:$0xf] %vm1639_vm2, %v1878_v1 }
 0x20c   :  { %v3989_v24 = vld [vmem:[#allocation22_spill] sm:$0xff]  ;;  %v1883_v7 = vpack.c.bf16 %v4001_v13, %v4001_v13  ;;  %v1884_v22 = vpack.c.bf16 %v4002_v38, %v4002_v38  ;;  %v4005_v58 = vmax.f32 %v3119_v23, 0.0  ;;  %v4006_v2 = vmax.f32 %v3123_v41, 0.0  ;;  %1641 = vst.msk [vmem:[%s3853_s4 + $0x4] sm:$0xf] %vm1639_vm2, %v1879_v36 }
 0x20d   :  { %v3990_v12 = vld [vmem:[#allocation24_spill] sm:$0xff]  ;;  %v1885_v31 = vpack.c.bf16 %v4003_v51, %v4003_v51  ;;  %v1886_v47 = vpack.c.bf16 %v4004_v32, %v4004_v32  ;;  %v4007_v9 = vmax.f32 %v3127_v19, 0.0  ;;  %1642 = vst.msk [vmem:[%s3853_s4 + $0x8] sm:$0xf] %vm1639_vm2, %v1880_v60  ;;  %1643 = vst.msk [vmem:[%s3853_s4 + $0xc] sm:$0xf] %vm1639_vm2, %v1881_v55 }
 0x20e   :  { %v1887_v0 = vpack.c.bf16 %v4005_v58, %v4005_v58  ;;  %v1888_v13 = vpack.c.bf16 %v4006_v2, %v4006_v2  ;;  %v4008_v37 = vmax.f32 %v3131_v11, 0.0  ;;  %v4009_v23 = vmax.f32 %v3135_v16, 0.0  ;;  %1644 = vst.msk [vmem:[%s3853_s4 + $0x10] sm:$0xf] %vm1639_vm2, %v1882_v8  ;;  %1645 = vst.msk [vmem:[%s3853_s4 + $0x14] sm:$0xf] %vm1639_vm2, %v1883_v7 }
 0x20f   :  { %v3991_v53 = vld [vmem:[#allocation25_spill] sm:$0xff]  ;;  %v1889_v38 = vpack.c.bf16 %v4007_v9, %v4007_v9  ;;  %v4010_v19 = vmax.f32 %v3139_v27, 0.0  ;;  %v4011_v36 = vmax.f32 %v3143_v34, 0.0  ;;  %1646 = vst.msk [vmem:[%s3853_s4 + $0x18] sm:$0xf] %vm1639_vm2, %v1884_v22  ;;  %v4012_v11 = vmax.f32 %v3147_v45, 0.0 }
 0x210   :  { %v1890_v48 = vpack.c.bf16 %v4008_v37, %v4008_v37  ;;  %v1891_v41 = vpack.c.bf16 %v4009_v23, %v4009_v23  ;;  %1647 = vst.msk [vmem:[%s3853_s4 + $0x1c] sm:$0xf] %vm1639_vm2, %v1885_v31  ;;  %v4013_v27 = vmax.f32 %v3151_v52, 0.0  ;;  %v4014_v55 = vmax.f32 %v3155_v63, 0.0  ;;  %1648 = vst.msk [vmem:[%s3853_s4 + $0x20] sm:$0xf] %vm1639_vm2, %v1886_v47 }
 0x211   :  { %v1892_v1 = vpack.c.bf16 %v4010_v19, %v4010_v19  ;;  %v1893_v60 = vpack.c.bf16 %v4011_v36, %v4011_v36  ;;  %v1894_v16 = vpack.c.bf16 %v4012_v11, %v4012_v11  ;;  %v4015_v7 = vmax.f32 %v3159_v6, 0.0  ;;  %1649 = vst.msk [vmem:[%s3853_s4 + $0x24] sm:$0xf] %vm1639_vm2, %v1887_v0  ;;  %1650 = vst.msk [vmem:[%s3853_s4 + $0x28] sm:$0xf] %vm1639_vm2, %v1888_v13  ;;  %v4034_v36 = vld [vmem:[#allocation13_spill] sm:$0xff] }
 0x212   :  { %v1895_v34 = vpack.c.bf16 %v4013_v27, %v4013_v27  ;;  %v1896_v8 = vpack.c.bf16 %v4014_v55, %v4014_v55  ;;  %1651 = vst.msk [vmem:[%s3853_s4 + $0x2c] sm:$0xf] %vm1639_vm2, %v1889_v38  ;;  %v4016_v45 = vmax.f32 %v3163_v21, 0.0  ;;  %v4017_v63 = vmax.f32 %v3167_v30, 0.0  ;;  %1652 = vst.msk [vmem:[%s3853_s4 + $0x30] sm:$0xf] %vm1639_vm2, %v1890_v48 }
 0x213   :  { %v1897_v22 = vpack.c.bf16 %v4015_v7, %v4015_v7  ;;  %v4018_v51 = vmax.f32 %v3171_v43, 0.0  ;;  %v4019_v32 = vmax.f32 %v3175_v3, 0.0  ;;  %1653 = vst.msk [vmem:[%s3853_s4 + $0x34] sm:$0xf] %vm1639_vm2, %v1891_v41  ;;  %1654 = vst.msk [vmem:[%s3853_s4 + $0x38] sm:$0xf] %vm1639_vm2, %v1892_v1 }
 0x214   :  { %v1898_v52 = vpack.c.bf16 %v4016_v45, %v4016_v45  ;;  %v1899_v6 = vpack.c.bf16 %v4017_v63, %v4017_v63  ;;  %1655 = vst.msk [vmem:[%s3853_s4 + $0x3c] sm:$0xf] %vm1639_vm2, %v1893_v60  ;;  %v4020_v21 = vmax.f32 %v3179_v5, 0.0  ;;  %v4021_v43 = vmax.f32 %v3183_v50, 0.0  ;;  %1656 = vst.msk [vmem:[%s3853_s4 + $0x40] sm:$0xf] %vm1639_vm2, %v1894_v16 }
 0x215   :  { %v1900_v31 = vpack.c.bf16 %v4018_v51, %v4018_v51  ;;  %v1901_v47 = vpack.c.bf16 %v4019_v32, %v4019_v32  ;;  %v4022_v58 = vmax.f32 %v3187_v59, 0.0  ;;  %v4023_v2 = vmax.f32 %v3191_v57, 0.0  ;;  %1657 = vst.msk [vmem:[%s3853_s4 + $0x44] sm:$0xf] %vm1639_vm2, %v1895_v34  ;;  %1658 = vst.msk [vmem:[%s3853_s4 + $0x48] sm:$0xf] %vm1639_vm2, %v1896_v8 }
 0x216   :  { %v1902_v30 = vpack.c.bf16 %v4020_v21, %v4020_v21  ;;  %v1903_v3 = vpack.c.bf16 %v4021_v43, %v4021_v43  ;;  %1659 = vst.msk [vmem:[%s3853_s4 + $0x4c] sm:$0xf] %vm1639_vm2, %v1897_v22  ;;  %v4024_v5 = vmax.f32 %v3195_v18, 0.0  ;;  %v4025_v59 = vmax.f32 %v3199_v29, 0.0  ;;  %1660 = vst.msk [vmem:[%s3853_s4 + $0x50] sm:$0xf] %vm1639_vm2, %v1898_v52 }
 0x217   :  { %v1904_v0 = vpack.c.bf16 %v4022_v58, %v4022_v58  ;;  %v1905_v13 = vpack.c.bf16 %v4023_v2, %v4023_v2  ;;  %v4026_v9 = vmax.f32 %v3203_v33, 0.0  ;;  %v4027_v37 = vmax.f32 %v3207_v42, 0.0  ;;  %1661 = vst.msk [vmem:[%s3853_s4 + $0x54] sm:$0xf] %vm1639_vm2, %v1899_v6  ;;  %1662 = vst.msk [vmem:[%s3853_s4 + $0x58] sm:$0xf] %vm1639_vm2, %v1900_v31 }
 0x218   :  { %v1906_v50 = vpack.c.bf16 %v4024_v5, %v4024_v5  ;;  %v1907_v57 = vpack.c.bf16 %v4025_v59, %v4025_v59  ;;  %1663 = vst.msk [vmem:[%s3853_s4 + $0x5c] sm:$0xf] %vm1639_vm2, %v1901_v47  ;;  %v4028_v18 = vmax.f32 %v3211_v49, 0.0  ;;  %v4029_v33 = vmax.f32 %v3215_v40, 0.0  ;;  %1664 = vst.msk [vmem:[%s3853_s4 + $0x60] sm:$0xf] %vm1639_vm2, %v1902_v30 }
 0x219   :  { %v1908_v38 = vpack.c.bf16 %v4026_v9, %v4026_v9  ;;  %v1909_v48 = vpack.c.bf16 %v4027_v37, %v4027_v37  ;;  %v4030_v23 = vmax.f32 %v3219_v39, 0.0  ;;  %v4031_v19 = vmax.f32 %v3223_v61, 0.0  ;;  %1665 = vst.msk [vmem:[%s3853_s4 + $0x64] sm:$0xf] %vm1639_vm2, %v1903_v3  ;;  %1666 = vst.msk [vmem:[%s3853_s4 + $0x68] sm:$0xf] %vm1639_vm2, %v1904_v0 }
 0x21a   :  { %v1910_v29 = vpack.c.bf16 %v4028_v18, %v4028_v18  ;;  %v1911_v42 = vpack.c.bf16 %v4029_v33, %v4029_v33  ;;  %1667 = vst.msk [vmem:[%s3853_s4 + $0x6c] sm:$0xf] %vm1639_vm2, %v1905_v13  ;;  %v4032_v49 = vmax.f32 %v3227_v20, 0.0  ;;  %v4033_v39 = vmax.f32 %v3231_v26, 0.0  ;;  %v4036_v16 = vld [vmem:[#allocation15_spill] sm:$0xff]  ;;  %v4038_v20 = vld [vmem:[#allocation17_spill] sm:$0xff] }
 0x21b   :  { %v1912_v41 = vpack.c.bf16 %v4030_v23, %v4030_v23  ;;  %v1913_v1 = vpack.c.bf16 %v4031_v19, %v4031_v19  ;;  %v4035_v60 = vmax.f32 %v4034_v36, 0.0  ;;  %v4037_v27 = vmax.f32 %v4036_v16, 0.0  ;;  %1668 = vst.msk [vmem:[%s3853_s4 + $0x70] sm:$0xf] %vm1639_vm2, %v1906_v50  ;;  %1669 = vst.msk [vmem:[%s3853_s4 + $0x74] sm:$0xf] %vm1639_vm2, %v1907_v57 }
 0x21c   :  { %v1914_v40 = vpack.c.bf16 %v4032_v49, %v4032_v49  ;;  %v1915_v61 = vpack.c.bf16 %v4033_v39, %v4033_v39  ;;  %1670 = vst.msk [vmem:[%s3853_s4 + $0x78] sm:$0xf] %vm1639_vm2, %v1908_v38  ;;  %1671 = vst.msk [vmem:[%s3853_s4 + $0x7c] sm:$0xf] %vm1639_vm2, %v1909_v48  ;;  %v4039_v26 = vmax.f32 %v4038_v20, 0.0  ;;  %v4040_v8 = vld [vmem:[#allocation19_spill] sm:$0xff] }
 0x21d   :  { %v1916_v11 = vpack.c.bf16 %v4035_v60, %v4035_v60  ;;  %v1917_v34 = vpack.c.bf16 %v4037_v27, %v4037_v27  ;;  %v4041_v7 = vmax.f32 %v4040_v8, 0.0  ;;  %v4042_v45 = vld [vmem:[#allocation21_spill] sm:$0xff]  ;;  %v4044_v6 = vmax.f32 %v3255_v17, 0.0  ;;  %1672 = vst.msk [vmem:[%s3853_s4 + $0x80] sm:$0xf] %vm1639_vm2, %v1910_v29  ;;  %v4048_v43 = vld [vmem:[#allocation23_spill] sm:$0xff] }
 0x21e   :  { %v1918_v55 = vpack.c.bf16 %v4039_v26, %v4039_v26  ;;  %v4043_v52 = vmax.f32 %v4042_v45, 0.0  ;;  %1673 = vst.msk [vmem:[%s3853_s4 + $0x84] sm:$0xf] %vm1639_vm2, %v1911_v42  ;;  %1674 = vst.msk [vmem:[%s3853_s4 + $0x88] sm:$0xf] %vm1639_vm2, %v1912_v41  ;;  %v4045_v17 = vmax.f32 %v3259_v28, 0.0 }
 0x21f   :  { %v1919_v22 = vpack.c.bf16 %v4041_v7, %v4041_v7  ;;  %v1921_v51 = vpack.c.bf16 %v4044_v6, %v4044_v6  ;;  %1675 = vst.msk [vmem:[%s3853_s4 + $0x8c] sm:$0xf] %vm1639_vm2, %v1913_v1  ;;  %v4046_v32 = vmax.f32 %v3263_v35, 0.0  ;;  %v4047_v21 = vmax.f32 %v3267_v46, 0.0  ;;  %1676 = vst.msk [vmem:[%s3853_s4 + $0x90] sm:$0xf] %vm1639_vm2, %v1914_v40 }
 0x220   :  { %v1920_v63 = vpack.c.bf16 %v4043_v52, %v4043_v52  ;;  %v1922_v31 = vpack.c.bf16 %v4045_v17, %v4045_v17  ;;  %v4049_v3 = vmax.f32 %v4048_v43, 0.0  ;;  %1677 = vst.msk [vmem:[%s3853_s4 + $0x94] sm:$0xf] %vm1639_vm2, %v1915_v61  ;;  %1678 = vst.msk [vmem:[%s3853_s4 + $0x98] sm:$0xf] %vm1639_vm2, %v1916_v11  ;;  %v4050_v28 = vld [vmem:[#allocation14_spill] sm:$0xff] }
 0x221   :  { %v1923_v47 = vpack.c.bf16 %v4046_v32, %v4046_v32  ;;  %v1924_v30 = vpack.c.bf16 %v4047_v21, %v4047_v21  ;;  %1679 = vst.msk [vmem:[%s3853_s4 + $0x9c] sm:$0xf] %vm1639_vm2, %v1917_v34  ;;  %v4051_v35 = vmax.f32 %v4050_v28, 0.0  ;;  %v4052_v0 = vld [vmem:[#allocation16_spill] sm:$0xff]  ;;  %v4054_v5 = vld [vmem:[#allocation18_spill] sm:$0xff]  ;;  %v4058_v37 = vmax.f32 %v3989_v24, 0.0 }
 0x222   :  { %v1925_v58 = vpack.c.bf16 %v4049_v3, %v4049_v3  ;;  %v4053_v2 = vmax.f32 %v4052_v0, 0.0  ;;  %v4055_v50 = vmax.f32 %v4054_v5, 0.0  ;;  %v4056_v57 = vld [vmem:[#allocation20_spill] sm:$0xff]  ;;  %1680 = vst.msk [vmem:[%s3853_s4 + $0xa0] sm:$0xf] %vm1639_vm2, %v1918_v55  ;;  %v4059_v18 = vmax.f32 %v3990_v12, 0.0 }
 0x223   :  { %v1926_v46 = vpack.c.bf16 %v4051_v35, %v4051_v35  ;;  %v4057_v9 = vmax.f32 %v4056_v57, 0.0  ;;  %1681 = vst.msk [vmem:[%s3853_s4 + $0xa4] sm:$0xf] %vm1639_vm2, %v1919_v22  ;;  %1682 = vst.msk [vmem:[%s3853_s4 + $0xa8] sm:$0xf] %vm1639_vm2, %v1920_v63  ;;  %v1930_v48 = vpack.c.bf16 %v4058_v37, %v4058_v37  ;;  %v4060_v33 = vmax.f32 %v3299_v4, 0.0 }
 0x224   :  { %v1927_v13 = vpack.c.bf16 %v4053_v2, %v4053_v2  ;;  %v1928_v59 = vpack.c.bf16 %v4055_v50, %v4055_v50  ;;  %1683 = vst.msk [vmem:[%s3853_s4 + $0xac] sm:$0xf] %vm1639_vm2, %v1921_v51  ;;  %v1931_v29 = vpack.c.bf16 %v4059_v18, %v4059_v18  ;;  %v4061_v23 = vmax.f32 %v3303_v15, 0.0  ;;  %1684 = vst.msk [vmem:[%s3853_s4 + $0xb0] sm:$0xf] %vm1639_vm2, %v1922_v31 }
 0x225   :  { %v1929_v38 = vpack.c.bf16 %v4057_v9, %v4057_v9  ;;  %v1932_v42 = vpack.c.bf16 %v4060_v33, %v4060_v33  ;;  %1685 = vst.msk [vmem:[%s3853_s4 + $0xb4] sm:$0xf] %vm1639_vm2, %v1923_v47  ;;  %1686 = vst.msk [vmem:[%s3853_s4 + $0xb8] sm:$0xf] %vm1639_vm2, %v1924_v30  ;;  %v4062_v24 = vmax.f32 %v3307_v62, 0.0  ;;  %v4063_v4 = vmax.f32 %v3311_v54, 0.0 }
 0x226   :  { %v1933_v41 = vpack.c.bf16 %v4061_v23, %v4061_v23  ;;  %1687 = vst.msk [vmem:[%s3853_s4 + $0xbc] sm:$0xf] %vm1639_vm2, %v1925_v58  ;;  %v4064_v19 = vmax.f32 %v3991_v53, 0.0  ;;  %v4065_v49 = vmax.f32 %v3992_v14, 0.0  ;;  %1688 = vst.msk [vmem:[%s3853_s4 + $0xc0] sm:$0xf] %vm1639_vm2, %v1926_v46 }
 0x227   :  { %v1934_v12 = vpack.c.bf16 %v4062_v24, %v4062_v24  ;;  %v1935_v15 = vpack.c.bf16 %v4063_v4, %v4063_v4  ;;  %1689 = vst.msk [vmem:[%s3853_s4 + $0xc4] sm:$0xf] %vm1639_vm2, %v1927_v13  ;;  %1690 = vst.msk [vmem:[%s3853_s4 + $0xc8] sm:$0xf] %vm1639_vm2, %v1928_v59  ;;  %v4066_v53 = vmax.f32 %v3993_v56, 0.0  ;;  %v4067_v54 = vmax.f32 %v3994_v25, 0.0 }
 0x228   :  { %v1936_v1 = vpack.c.bf16 %v4064_v19, %v4064_v19  ;;  %v1937_v40 = vpack.c.bf16 %v4065_v49, %v4065_v49  ;;  %1691 = vst.msk [vmem:[%s3853_s4 + $0xcc] sm:$0xf] %vm1639_vm2, %v1929_v38  ;;  %v4068_v39 = vmax.f32 %v3995_v10, 0.0  ;;  %v4069_v36 = vmax.f32 %v3335_v44, 0.0  ;;  %1692 = vst.msk [vmem:[%s3853_s4 + $0xd0] sm:$0xf] %vm1639_vm2, %v1930_v48 }
 0x229   :  { %v1938_v62 = vpack.c.bf16 %v4066_v53, %v4066_v53  ;;  %v1939_v14 = vpack.c.bf16 %v4067_v54, %v4067_v54  ;;  %1693 = vst.msk [vmem:[%s3853_s4 + $0xd4] sm:$0xf] %vm1639_vm2, %v1931_v29  ;;  %1694 = vst.msk [vmem:[%s3853_s4 + $0xd8] sm:$0xf] %vm1639_vm2, %v1932_v42 }
 0x22a   :  { %v1940_v61 = vpack.c.bf16 %v4068_v39, %v4068_v39  ;;  %v1941_v60 = vpack.c.bf16 %v4069_v36, %v4069_v36  ;;  %1695 = vst.msk [vmem:[%s3853_s4 + $0xdc] sm:$0xf] %vm1639_vm2, %v1933_v41  ;;  %1696 = vst.msk [vmem:[%s3853_s4 + $0xe0] sm:$0xf] %vm1639_vm2, %v1934_v12 }
 0x22b   :  { %1697 = vst.msk [vmem:[%s3853_s4 + $0xe4] sm:$0xf] %vm1639_vm2, %v1935_v15  ;;  %1698 = vst.msk [vmem:[%s3853_s4 + $0xe8] sm:$0xf] %vm1639_vm2, %v1936_v1 }
 0x22c   :  { %1699 = vst.msk [vmem:[%s3853_s4 + $0xec] sm:$0xf] %vm1639_vm2, %v1937_v40  ;;  %1700 = vst.msk [vmem:[%s3853_s4 + $0xf0] sm:$0xf] %vm1639_vm2, %v1938_v62 }
 0x22d   :  { %1701 = vst.msk [vmem:[%s3853_s4 + $0xf4] sm:$0xf] %vm1639_vm2, %v1939_v14  ;;  %1702 = vst.msk [vmem:[%s3853_s4 + $0xf8] sm:$0xf] %vm1639_vm2, %v1940_v61 }
 0x22e   :  { %1703 = vst.msk [vmem:[%s3853_s4 + $0xfc] sm:$0xf] %vm1639_vm2, %v1941_v60 }

</bundles_post_ra>
